<compile_context>
chip_gen: v6e
topology: v6e:2x2x1
jax: 0.10.0
libtpu: 0.0.40
codegen_flags: <defaults>
</compile_context>

<pallas_src>
import jax
import jax.numpy as jnp
from jax import lax
from jax.experimental import pallas as pl
from jax.experimental.pallas import tpu as pltpu


def _round_up(x, m):
    return ((x + m - 1) // m) * m


# ---------------------------------------------------------------------------
# Kernel 1: GRU recurrence.  grid = (batch_tiles [parallel], time_tiles [arbitrary])
# ---------------------------------------------------------------------------
def gru_recurrence_kernel(emb_ref, lens_ref, wih_ref, whh_ref, hseq_ref,
                          gi_ref, h_ref):
    """One (batch tile, time tile) block of the GRU recurrence.

    emb_ref  : (1, 1, TT*BT, E) f32  embedded inputs for this block (rows = tt*BT + b)
    lens_ref : (BT, 1)          i32  valid sequence lengths for this batch tile
    wih_ref  : (E, 3Hp)         f32  W_ih^T, gate g in columns [g*Hp, g*Hp+H)
    whh_ref  : (Hp, 3Hp)        f32  W_hh^T, same gate layout
    hseq_ref : (TT, BT, Hp)     f32  output hidden states (0 at padded steps)
    gi_ref   : (TT*BT, 3Hp)     f32  VMEM scratch: precomputed input gates
    h_ref    : (BT, Hp)         f32  VMEM scratch: hidden state carried across T tiles
    """
    TT, BT, Hp = hseq_ref.shape
    t_tile = pl.program_id(1)

    @pl.when(t_tile == 0)
    def _():
        h_ref[...] = jnp.zeros_like(h_ref)

    # Hoisted input-to-hidden matmul: one large MXU call per grid step instead of
    # TT tiny per-timestep matmuls.
    gi_ref[...] = jnp.dot(emb_ref[0, 0], wih_ref[...],
                          preferred_element_type=jnp.float32)

    lens = lens_ref[...]                  # (BT, 1) int32, loaded once
    t_base = t_tile * TT

    def step(tt, h):
        gi = gi_ref[pl.ds(tt * BT, BT), :]                      # (BT, 3Hp)
        gh = jnp.dot(h, whh_ref[...], preferred_element_type=jnp.float32)
        r = jax.nn.sigmoid(gi[:, 0:Hp] + gh[:, 0:Hp])
        z = jax.nn.sigmoid(gi[:, Hp:2 * Hp] + gh[:, Hp:2 * Hp])
        n = jnp.tanh(gi[:, 2 * Hp:3 * Hp] + r * gh[:, 2 * Hp:3 * Hp])
        h_new = (1.0 - z) * n + z * h
        valid = (t_base + tt) < lens                            # (BT, 1) bool
        # pack_padded / pad_packed semantics: zero output, frozen hidden past length.
        hseq_ref[tt] = jnp.where(valid, h_new, 0.0)
        return jnp.where(valid, h_new, h)

    # Hidden state stays vreg-resident across the unrolled time steps; only one
    # VMEM store per T tile.
    h_ref[...] = lax.fori_loop(0, TT, step, h_ref[...], unroll=True)


# ---------------------------------------------------------------------------
# Kernel 2: output projection, tanh(h @ W_out^T), tiled over (rows, V).
# ---------------------------------------------------------------------------
def projection_kernel(h_ref, w_ref, out_ref):
    out_ref[...] = jnp.tanh(
        jnp.dot(h_ref[...], w_ref[...], preferred_element_type=jnp.float32)
    ).astype(out_ref.dtype)


# ---------------------------------------------------------------------------
# Weight preparation: transpose + zero-pad to 128-lane-aligned gate layout.
# ---------------------------------------------------------------------------
def _prep_weights(w_ih, w_hh, w_out, Hp, Vp):
    H3, E = w_ih.shape
    H = H3 // 3
    V = w_out.shape[0]
    w_ihT = jnp.zeros((E, 3 * Hp), jnp.float32)
    w_hhT = jnp.zeros((Hp, 3 * Hp), jnp.float32)
    for g in range(3):                      # PyTorch gate order [r, z, n]
        w_ihT = w_ihT.at[:, g * Hp:g * Hp + H].set(
            w_ih[g * H:(g + 1) * H, :].T.astype(jnp.float32))
        w_hhT = w_hhT.at[:H, g * Hp:g * Hp + H].set(
            w_hh[g * H:(g + 1) * H, :].T.astype(jnp.float32))
    w_outT = jnp.zeros((Hp, Vp), jnp.float32)
    w_outT = w_outT.at[:H, :V].set(w_out.T.astype(jnp.float32))
    return w_ihT, w_hhT, w_outT


# ---------------------------------------------------------------------------
# Forward wrapper.  x: (B, T) int ids, x_lens: (B,) lengths -> (B, T, V) f32 logits.
# ---------------------------------------------------------------------------
def gru4rec_forward(x, x_lens, params, *, tt_max=16, bt_max=128,
                    vt_max=512, rm_max=256):
    emb_w = params["emb"]       # (V, E)
    w_ih = params["w_ih"]       # (3H, E)
    w_hh = params["w_hh"]       # (3H, H)
    w_out = params["w_out"]     # (V, H)

    B, T = x.shape
    V, H = w_out.shape
    E = w_ih.shape[1]

    # Padded / tiled dimensions (lane = 128, sublane = 8).
    Hp = _round_up(H, 128)
    VT = min(vt_max, _round_up(V, 128))
    Vp = _round_up(V, VT)
    BT = min(bt_max, _round_up(B, 8))
    Bp = _round_up(max(B, 8), BT)
    TT = min(tt_max, T)
    T_pad = _round_up(T, TT)
    grid_b = Bp // BT
    grid_t = T_pad // TT

    w_ihT, w_hhT, w_outT = _prep_weights(w_ih, w_hh, w_out, Hp, Vp)

    # Embedding lookup (glue) + time-major padded layout.
    seq_emb = emb_w[x].astype(jnp.float32)                       # (B, T, E)
    emb = jnp.zeros((T_pad, Bp, E), jnp.float32)
    emb = emb.at[:T, :B, :].set(jnp.transpose(seq_emb, (1, 0, 2)))
    # Pre-flatten rows per (time-tile, batch-tile) block so the kernel can issue a
    # single (TT*BT, E) @ (E, 3Hp) matmul without any in-kernel reshape.
    emb_blk = (emb.reshape(grid_t, TT, grid_b, BT, E)
                  .transpose(0, 2, 1, 3, 4)
                  .reshape(grid_t, grid_b, TT * BT, E))

    # Replaces the (T, B, 1) f32 mask: tiny (Bp, 1) int32 lengths, compared in-kernel.
    lens = jnp.zeros((Bp, 1), jnp.int32).at[:B, 0].set(x_lens.astype(jnp.int32))

    h_seq = pl.pallas_call(
        gru_recurrence_kernel,
        out_shape=jax.ShapeDtypeStruct((T_pad, Bp, Hp), jnp.float32),
        grid=(grid_b, grid_t),
        in_specs=[
            pl.BlockSpec((1, 1, TT * BT, E), lambda b, t: (t, b, 0, 0)),
            pl.BlockSpec((BT, 1), lambda b, t: (b, 0)),
            pl.BlockSpec((E, 3 * Hp), lambda b, t: (0, 0)),
            pl.BlockSpec((Hp, 3 * Hp), lambda b, t: (0, 0)),
        ],
        out_specs=pl.BlockSpec((TT, BT, Hp), lambda b, t: (t, b, 0)),
        scratch_shapes=[
            pltpu.VMEM((TT * BT, 3 * Hp), jnp.float32),  # precomputed input gates
            pltpu.VMEM((BT, Hp), jnp.float32),           # hidden carry across T tiles
        ],
        compiler_params=pltpu.CompilerParams(
            dimension_semantics=("parallel", "arbitrary")),
    )(emb_blk, lens, w_ihT, w_hhT)

    # Re-order hidden states to (B, T) row order (small tensor: B*T*Hp, cheap).
    h_rows = jnp.transpose(h_seq[:T, :B, :], (1, 0, 2)).reshape(B * T, Hp)
    rows = B * T
    RM = min(rm_max, _round_up(rows, 8))
    rows_p = _round_up(rows, RM)
    if rows_p != rows:
        h_rows = jnp.zeros((rows_p, Hp), jnp.float32).at[:rows].set(h_rows)

    # Tiled projection: logits written directly in (B, T) row order -> free reshape,
    # no transpose over the (B, T, V) tensor.
    out_flat = pl.pallas_call(
        projection_kernel,
        out_shape=jax.ShapeDtypeStruct((rows_p, Vp), jnp.float32),
        grid=(rows_p // RM, Vp // VT),
        in_specs=[
            pl.BlockSpec((RM, Hp), lambda i, j: (i, 0)),
            pl.BlockSpec((Hp, VT), lambda i, j: (0, j)),
        ],
        out_specs=pl.BlockSpec((RM, VT), lambda i, j: (i, j)),
        compiler_params=pltpu.CompilerParams(
            dimension_semantics=("parallel", "parallel")),
    )(h_rows, w_outT)

    return out_flat[:rows, :V].reshape(B, T, V)


# ---------------------------------------------------------------------------
# Pure-JAX reference (lax.scan) for correctness checking.
# ---------------------------------------------------------------------------
def gru4rec_reference(x, x_lens, params):
    emb_w, w_ih, w_hh, w_out = params["emb"], params["w_ih"], params["w_hh"], params["w_out"]
    B, T = x.shape
    H = w_hh.shape[1]
    seq_emb = jnp.transpose(emb_w[x], (1, 0, 2)).astype(jnp.float32)   # (T, B, E)
    mask = (jnp.arange(T, dtype=jnp.int32)[:, None] < x_lens[None, :]).astype(jnp.float32)
    mask = mask[:, :, None]                                            # (T, B, 1)

    def cell(h, inp):
        x_t, m_t = inp
        gi = x_t @ w_ih.T
        gh = h @ w_hh.T
        r = jax.nn.sigmoid(gi[:, :H] + gh[:, :H])
        z = jax.nn.sigmoid(gi[:, H:2 * H] + gh[:, H:2 * H])
        n = jnp.tanh(gi[:, 2 * H:] + r * gh[:, 2 * H:])
        h_new = (1.0 - z) * n + z * h
        h_valid = h_new * m_t
        return h_valid + (1.0 - m_t) * h, h_valid

    _, h_seq = lax.scan(cell, jnp.zeros((B, H), jnp.float32), (seq_emb, mask))
    out = jnp.tanh(jnp.einsum("tbh,vh->tbv", h_seq, w_out))
    return jnp.transpose(out, (1, 0, 2))


def init_params(key, *, item_maxid, embed_dim, hidden_size):
    """Deterministic synthetic init mirroring GRU4Rec.init_param shapes."""
    V = item_maxid + 1
    k_emb, k_ih, k_hh, k_out = jax.random.split(key, 4)
    emb = jax.random.normal(k_emb, (V, embed_dim), jnp.float32) * jnp.sqrt(2.0 / V)
    emb = emb.at[0].set(0.0)  # padding_idx = 0
    ortho = jax.nn.initializers.orthogonal()
    w_ih = ortho(k_ih, (3 * hidden_size, embed_dim), jnp.float32)
    w_hh = ortho(k_hh, (3 * hidden_size, hidden_size), jnp.float32)
    # GRU biases are constant 0.0 in init_param -> folded away.
    w_out = jax.random.normal(k_out, (V, hidden_size), jnp.float32) * jnp.sqrt(2.0 / V)
    return {"emb": emb, "w_ih": w_ih, "w_hh": w_hh, "w_out": w_out}


if __name__ == "__main__":
    # Small, module-consistent shapes.
    B, T = 4, 8
    item_maxid = 127          # vocab V = 128
    embed_dim = 32
    hidden_size = 32

    key = jax.random.PRNGKey(0)
    k_params, k_x, k_len = jax.random.split(key, 3)

    params = init_params(k_params, item_maxid=item_maxid,
                         embed_dim=embed_dim, hidden_size=hidden_size)

    x_lens = jax.random.randint(k_len, (B,), 1, T + 1, dtype=jnp.int32)
    x = jax.random.randint(k_x, (B, T), 1, item_maxid + 1, dtype=jnp.int32)
    # zero-pad ids beyond each sequence's length (padding_idx = 0)
    valid = jnp.arange(T, dtype=jnp.int32)[None, :] < x_lens[:, None]
    x = jnp.where(valid, x, 0)

    out = gru4rec_forward(x, x_lens, params)
    out = jax.block_until_ready(out)

    ref = gru4rec_reference(x, x_lens, params)
    assert out.shape == (B, T, item_maxid + 1)
    assert jnp.allclose(out, ref, atol=1e-5, rtol=1e-5), "Pallas kernel mismatch vs JAX reference"

    print("KERNEL_OK")
</pallas_src>

<mosaic_0001>
module attributes {stable_mosaic.version = 11 : i64} {
  func.func @gru_recurrence_kernel(%arg0: i32, %arg1: i32, %arg2: memref<1x1x64x32xf32, #tpu.memory_space<vmem>>, %arg3: memref<8x1xi32, #tpu.memory_space<vmem>>, %arg4: memref<32x384xf32, #tpu.memory_space<vmem>>, %arg5: memref<128x384xf32, #tpu.memory_space<vmem>>, %arg6: memref<8x8x128xf32, #tpu.memory_space<vmem>>, %arg7: memref<64x384xf32, #tpu.memory_space<vmem>>, %arg8: memref<8x128xf32, #tpu.memory_space<vmem>>) attributes {dimension_semantics = [#tpu.dimension_semantics<parallel>, #tpu.dimension_semantics<arbitrary>], iteration_bounds = array<i64: 1, 1>, scalar_prefetch = 0 : i64, scratch_operands = 2 : i64, tpu.core_type = #tpu.core_type<tc>, window_params = [{transform_indices = @transform_0, window_bounds = array<i64: 1, 1, 64, 32>}, {transform_indices = @transform_1, window_bounds = array<i64: 8, 1>}, {pipeline_mode = #tpu.pipeline_mode<synchronous>, transform_indices = @transform_2, window_bounds = array<i64: 32, 384>}, {pipeline_mode = #tpu.pipeline_mode<synchronous>, transform_indices = @transform_3, window_bounds = array<i64: 128, 384>}, {transform_indices = @transform_4, window_bounds = array<i64: 8, 8, 128>}]} {
    %c0_i32 = arith.constant 0 : i32
    %0 = arith.cmpi eq, %arg1, %c0_i32 : i32
    %1 = arith.extui %0 : i1 to i32
    %c0_i32_0 = arith.constant 0 : i32
    %2 = arith.cmpi ne, %1, %c0_i32_0 : i32
    scf.if %2 {
      %cst_104 = arith.constant 0.000000e+00 : f32
      %372 = vector.broadcast %cst_104 : f32 to vector<8x128xf32>
      %c0_105 = arith.constant 0 : index
      %c0_106 = arith.constant 0 : index
      %373 = vector.load %arg8[%c0_105, %c0_106] : memref<8x128xf32, #tpu.memory_space<vmem>>, vector<8x128xf32>
      tpu.vector_store %arg8[%c0_105, %c0_106], %372 {strides = array<i32>} : memref<8x128xf32, #tpu.memory_space<vmem>>, vector<8x128xf32>,
    } else {
    }
    %c0 = arith.constant 0 : index
    %c0_1 = arith.constant 0 : index
    %c0_2 = arith.constant 0 : index
    %c0_3 = arith.constant 0 : index
    %3 = vector.load %arg2[%c0, %c0_1, %c0_2, %c0_3] : memref<1x1x64x32xf32, #tpu.memory_space<vmem>>, vector<1x1x64x32xf32>
    %4 = vector.shape_cast %3 : vector<1x1x64x32xf32> to vector<64x32xf32>
    %c0_4 = arith.constant 0 : index
    %c0_5 = arith.constant 0 : index
    %5 = vector.load %arg4[%c0_4, %c0_5] : memref<32x384xf32, #tpu.memory_space<vmem>>, vector<32x384xf32>
    %cst = arith.constant dense<0.000000e+00> : vector<64x384xf32>
    %6 = tpu.matmul %4, %5, %cst {dimension_numbers = #tpu.dot_dimension_numbers<[1], [0], [0], [1], [0, 0, 1, 1], [], []>} : vector<64x32xf32>, vector<32x384xf32>, vector<64x384xf32> -> vector<64x384xf32>
    %c0_6 = arith.constant 0 : index
    %c0_7 = arith.constant 0 : index
    %7 = vector.load %arg7[%c0_6, %c0_7] : memref<64x384xf32, #tpu.memory_space<vmem>>, vector<64x384xf32>
    tpu.vector_store %arg7[%c0_6, %c0_7], %6 {strides = array<i32>} : memref<64x384xf32, #tpu.memory_space<vmem>>, vector<64x384xf32>,
    %c0_8 = arith.constant 0 : index
    %c0_9 = arith.constant 0 : index
    %8 = vector.load %arg3[%c0_8, %c0_9] : memref<8x1xi32, #tpu.memory_space<vmem>>, vector<8x1xi32>
    %c8_i32 = arith.constant 8 : i32
    %9 = arith.muli %arg1, %c8_i32 : i32
    %c0_10 = arith.constant 0 : index
    %c0_11 = arith.constant 0 : index
    %10 = vector.load %arg8[%c0_10, %c0_11] : memref<8x128xf32, #tpu.memory_space<vmem>>, vector<8x128xf32>
    %c0_i32_12 = arith.constant 0 : i32
    %c8_i32_13 = arith.constant 8 : i32
    %11 = arith.muli %c0_i32_12, %c8_i32_13 : i32
    %12 = arith.index_cast %11 : i32 to index
    %c0_14 = arith.constant 0 : index
    %13 = vector.load %arg7[%12, %c0_14] : memref<64x384xf32, #tpu.memory_space<vmem>>, vector<8x384xf32>
    %c0_15 = arith.constant 0 : index
    %c0_16 = arith.constant 0 : index
    %14 = vector.load %arg5[%c0_15, %c0_16] : memref<128x384xf32, #tpu.memory_space<vmem>>, vector<128x384xf32>
    %cst_17 = arith.constant dense<0.000000e+00> : vector<8x384xf32>
    %15 = tpu.matmul %10, %14, %cst_17 {dimension_numbers = #tpu.dot_dimension_numbers<[1], [0], [0], [1], [0, 0, 1, 1], [], []>} : vector<8x128xf32>, vector<128x384xf32>, vector<8x384xf32> -> vector<8x384xf32>
    %16 = vector.extract_strided_slice %13 {offsets = [0, 0], sizes = [8, 128], strides = [1, 1]} : vector<8x384xf32> to vector<8x128xf32>
    %17 = vector.extract_strided_slice %15 {offsets = [0, 0], sizes = [8, 128], strides = [1, 1]} : vector<8x384xf32> to vector<8x128xf32>
    %18 = arith.addf %16, %17 : vector<8x128xf32>
    %19 = arith.negf %18 : vector<8x128xf32>
    %20 = math.exp %19 : vector<8x128xf32>
    %cst_18 = arith.constant 1.000000e+00 : f32
    %21 = vector.broadcast %cst_18 : f32 to vector<8x128xf32>
    %22 = arith.addf %21, %20 : vector<8x128xf32>
    %23 = arith.divf %21, %22 : vector<8x128xf32>
    %24 = vector.extract_strided_slice %13 {offsets = [0, 128], sizes = [8, 128], strides = [1, 1]} : vector<8x384xf32> to vector<8x128xf32>
    %25 = vector.extract_strided_slice %15 {offsets = [0, 128], sizes = [8, 128], strides = [1, 1]} : vector<8x384xf32> to vector<8x128xf32>
    %26 = arith.addf %24, %25 : vector<8x128xf32>
    %27 = arith.negf %26 : vector<8x128xf32>
    %28 = math.exp %27 : vector<8x128xf32>
    %cst_19 = arith.constant 1.000000e+00 : f32
    %29 = vector.broadcast %cst_19 : f32 to vector<8x128xf32>
    %30 = arith.addf %29, %28 : vector<8x128xf32>
    %31 = arith.divf %29, %30 : vector<8x128xf32>
    %32 = vector.extract_strided_slice %13 {offsets = [0, 256], sizes = [8, 128], strides = [1, 1]} : vector<8x384xf32> to vector<8x128xf32>
    %33 = vector.extract_strided_slice %15 {offsets = [0, 256], sizes = [8, 128], strides = [1, 1]} : vector<8x384xf32> to vector<8x128xf32>
    %34 = arith.mulf %23, %33 : vector<8x128xf32>
    %35 = arith.addf %32, %34 : vector<8x128xf32>
    %36 = math.tanh %35 : vector<8x128xf32>
    %cst_20 = arith.constant 1.000000e+00 : f32
    %37 = vector.broadcast %cst_20 : f32 to vector<8x128xf32>
    %38 = arith.subf %37, %31 : vector<8x128xf32>
    %39 = arith.mulf %38, %36 : vector<8x128xf32>
    %40 = arith.mulf %31, %10 : vector<8x128xf32>
    %41 = arith.addf %39, %40 : vector<8x128xf32>
    %42 = arith.addi %9, %c0_i32_12 : i32
    %43 = vector.broadcast %42 : i32 to vector<8x1xi32>
    %44 = arith.cmpi slt, %43, %8 : vector<8x1xi32>
    %cst_21 = arith.constant 0.000000e+00 : f32
    %45 = vector.shape_cast %44 : vector<8x1xi1> to vector<8x1xi1>
    %46 = vector.broadcast %45 : vector<8x1xi1> to vector<8x128xi1>
    %47 = vector.broadcast %cst_21 : f32 to vector<8x128xf32>
    %48 = arith.select %46, %41, %47 : vector<8x128xi1>, vector<8x128xf32>
    %49 = arith.index_cast %c0_i32_12 : i32 to index
    %c0_22 = arith.constant 0 : index
    %c0_23 = arith.constant 0 : index
    %50 = vector.load %arg6[%49, %c0_22, %c0_23] : memref<8x8x128xf32, #tpu.memory_space<vmem>>, vector<1x8x128xf32>
    %51 = vector.shape_cast %50 : vector<1x8x128xf32> to vector<8x128xf32>
    %52 = vector.shape_cast %48 : vector<8x128xf32> to vector<1x8x128xf32>
    tpu.vector_store %arg6[%49, %c0_22, %c0_23], %52 {strides = array<i32>} : memref<8x8x128xf32, #tpu.memory_space<vmem>>, vector<1x8x128xf32>,
    %53 = vector.shape_cast %44 : vector<8x1xi1> to vector<8x1xi1>
    %54 = vector.broadcast %53 : vector<8x1xi1> to vector<8x128xi1>
    %55 = arith.select %54, %41, %10 : vector<8x128xi1>, vector<8x128xf32>
    %c1_i32 = arith.constant 1 : i32
    %c8_i32_24 = arith.constant 8 : i32
    %56 = arith.muli %c1_i32, %c8_i32_24 : i32
    %57 = arith.index_cast %56 : i32 to index
    %c0_25 = arith.constant 0 : index
    %58 = vector.load %arg7[%57, %c0_25] : memref<64x384xf32, #tpu.memory_space<vmem>>, vector<8x384xf32>
    %c0_26 = arith.constant 0 : index
    %c0_27 = arith.constant 0 : index
    %59 = vector.load %arg5[%c0_26, %c0_27] : memref<128x384xf32, #tpu.memory_space<vmem>>, vector<128x384xf32>
    %cst_28 = arith.constant dense<0.000000e+00> : vector<8x384xf32>
    %60 = tpu.matmul %55, %59, %cst_28 {dimension_numbers = #tpu.dot_dimension_numbers<[1], [0], [0], [1], [0, 0, 1, 1], [], []>} : vector<8x128xf32>, vector<128x384xf32>, vector<8x384xf32> -> vector<8x384xf32>
    %61 = vector.extract_strided_slice %58 {offsets = [0, 0], sizes = [8, 128], strides = [1, 1]} : vector<8x384xf32> to vector<8x128xf32>
    %62 = vector.extract_strided_slice %60 {offsets = [0, 0], sizes = [8, 128], strides = [1, 1]} : vector<8x384xf32> to vector<8x128xf32>
    %63 = arith.addf %61, %62 : vector<8x128xf32>
    %64 = arith.negf %63 : vector<8x128xf32>
    %65 = math.exp %64 : vector<8x128xf32>
    %cst_29 = arith.constant 1.000000e+00 : f32
    %66 = vector.broadcast %cst_29 : f32 to vector<8x128xf32>
    %67 = arith.addf %66, %65 : vector<8x128xf32>
    %68 = arith.divf %66, %67 : vector<8x128xf32>
    %69 = vector.extract_strided_slice %58 {offsets = [0, 128], sizes = [8, 128], strides = [1, 1]} : vector<8x384xf32> to vector<8x128xf32>
    %70 = vector.extract_strided_slice %60 {offsets = [0, 128], sizes = [8, 128], strides = [1, 1]} : vector<8x384xf32> to vector<8x128xf32>
    %71 = arith.addf %69, %70 : vector<8x128xf32>
    %72 = arith.negf %71 : vector<8x128xf32>
    %73 = math.exp %72 : vector<8x128xf32>
    %cst_30 = arith.constant 1.000000e+00 : f32
    %74 = vector.broadcast %cst_30 : f32 to vector<8x128xf32>
    %75 = arith.addf %74, %73 : vector<8x128xf32>
    %76 = arith.divf %74, %75 : vector<8x128xf32>
    %77 = vector.extract_strided_slice %58 {offsets = [0, 256], sizes = [8, 128], strides = [1, 1]} : vector<8x384xf32> to vector<8x128xf32>
    %78 = vector.extract_strided_slice %60 {offsets = [0, 256], sizes = [8, 128], strides = [1, 1]} : vector<8x384xf32> to vector<8x128xf32>
    %79 = arith.mulf %68, %78 : vector<8x128xf32>
    %80 = arith.addf %77, %79 : vector<8x128xf32>
    %81 = math.tanh %80 : vector<8x128xf32>
    %cst_31 = arith.constant 1.000000e+00 : f32
    %82 = vector.broadcast %cst_31 : f32 to vector<8x128xf32>
    %83 = arith.subf %82, %76 : vector<8x128xf32>
    %84 = arith.mulf %83, %81 : vector<8x128xf32>
    %85 = arith.mulf %76, %55 : vector<8x128xf32>
    %86 = arith.addf %84, %85 : vector<8x128xf32>
    %87 = arith.addi %9, %c1_i32 : i32
    %88 = vector.broadcast %87 : i32 to vector<8x1xi32>
    %89 = arith.cmpi slt, %88, %8 : vector<8x1xi32>
    %cst_32 = arith.constant 0.000000e+00 : f32
    %90 = vector.shape_cast %89 : vector<8x1xi1> to vector<8x1xi1>
    %91 = vector.broadcast %90 : vector<8x1xi1> to vector<8x128xi1>
    %92 = vector.broadcast %cst_32 : f32 to vector<8x128xf32>
    %93 = arith.select %91, %86, %92 : vector<8x128xi1>, vector<8x128xf32>
    %94 = arith.index_cast %c1_i32 : i32 to index
    %c0_33 = arith.constant 0 : index
    %c0_34 = arith.constant 0 : index
    %95 = vector.load %arg6[%94, %c0_33, %c0_34] : memref<8x8x128xf32, #tpu.memory_space<vmem>>, vector<1x8x128xf32>
    %96 = vector.shape_cast %95 : vector<1x8x128xf32> to vector<8x128xf32>
    %97 = vector.shape_cast %93 : vector<8x128xf32> to vector<1x8x128xf32>
    tpu.vector_store %arg6[%94, %c0_33, %c0_34], %97 {strides = array<i32>} : memref<8x8x128xf32, #tpu.memory_space<vmem>>, vector<1x8x128xf32>,
    %98 = vector.shape_cast %89 : vector<8x1xi1> to vector<8x1xi1>
    %99 = vector.broadcast %98 : vector<8x1xi1> to vector<8x128xi1>
    %100 = arith.select %99, %86, %55 : vector<8x128xi1>, vector<8x128xf32>
    %c2_i32 = arith.constant 2 : i32
    %c8_i32_35 = arith.constant 8 : i32
    %101 = arith.muli %c2_i32, %c8_i32_35 : i32
    %102 = arith.index_cast %101 : i32 to index
    %c0_36 = arith.constant 0 : index
    %103 = vector.load %arg7[%102, %c0_36] : memref<64x384xf32, #tpu.memory_space<vmem>>, vector<8x384xf32>
    %c0_37 = arith.constant 0 : index
    %c0_38 = arith.constant 0 : index
    %104 = vector.load %arg5[%c0_37, %c0_38] : memref<128x384xf32, #tpu.memory_space<vmem>>, vector<128x384xf32>
    %cst_39 = arith.constant dense<0.000000e+00> : vector<8x384xf32>
    %105 = tpu.matmul %100, %104, %cst_39 {dimension_numbers = #tpu.dot_dimension_numbers<[1], [0], [0], [1], [0, 0, 1, 1], [], []>} : vector<8x128xf32>, vector<128x384xf32>, vector<8x384xf32> -> vector<8x384xf32>
    %106 = vector.extract_strided_slice %103 {offsets = [0, 0], sizes = [8, 128], strides = [1, 1]} : vector<8x384xf32> to vector<8x128xf32>
    %107 = vector.extract_strided_slice %105 {offsets = [0, 0], sizes = [8, 128], strides = [1, 1]} : vector<8x384xf32> to vector<8x128xf32>
    %108 = arith.addf %106, %107 : vector<8x128xf32>
    %109 = arith.negf %108 : vector<8x128xf32>
    %110 = math.exp %109 : vector<8x128xf32>
    %cst_40 = arith.constant 1.000000e+00 : f32
    %111 = vector.broadcast %cst_40 : f32 to vector<8x128xf32>
    %112 = arith.addf %111, %110 : vector<8x128xf32>
    %113 = arith.divf %111, %112 : vector<8x128xf32>
    %114 = vector.extract_strided_slice %103 {offsets = [0, 128], sizes = [8, 128], strides = [1, 1]} : vector<8x384xf32> to vector<8x128xf32>
    %115 = vector.extract_strided_slice %105 {offsets = [0, 128], sizes = [8, 128], strides = [1, 1]} : vector<8x384xf32> to vector<8x128xf32>
    %116 = arith.addf %114, %115 : vector<8x128xf32>
    %117 = arith.negf %116 : vector<8x128xf32>
    %118 = math.exp %117 : vector<8x128xf32>
    %cst_41 = arith.constant 1.000000e+00 : f32
    %119 = vector.broadcast %cst_41 : f32 to vector<8x128xf32>
    %120 = arith.addf %119, %118 : vector<8x128xf32>
    %121 = arith.divf %119, %120 : vector<8x128xf32>
    %122 = vector.extract_strided_slice %103 {offsets = [0, 256], sizes = [8, 128], strides = [1, 1]} : vector<8x384xf32> to vector<8x128xf32>
    %123 = vector.extract_strided_slice %105 {offsets = [0, 256], sizes = [8, 128], strides = [1, 1]} : vector<8x384xf32> to vector<8x128xf32>
    %124 = arith.mulf %113, %123 : vector<8x128xf32>
    %125 = arith.addf %122, %124 : vector<8x128xf32>
    %126 = math.tanh %125 : vector<8x128xf32>
    %cst_42 = arith.constant 1.000000e+00 : f32
    %127 = vector.broadcast %cst_42 : f32 to vector<8x128xf32>
    %128 = arith.subf %127, %121 : vector<8x128xf32>
    %129 = arith.mulf %128, %126 : vector<8x128xf32>
    %130 = arith.mulf %121, %100 : vector<8x128xf32>
    %131 = arith.addf %129, %130 : vector<8x128xf32>
    %132 = arith.addi %9, %c2_i32 : i32
    %133 = vector.broadcast %132 : i32 to vector<8x1xi32>
    %134 = arith.cmpi slt, %133, %8 : vector<8x1xi32>
    %cst_43 = arith.constant 0.000000e+00 : f32
    %135 = vector.shape_cast %134 : vector<8x1xi1> to vector<8x1xi1>
    %136 = vector.broadcast %135 : vector<8x1xi1> to vector<8x128xi1>
    %137 = vector.broadcast %cst_43 : f32 to vector<8x128xf32>
    %138 = arith.select %136, %131, %137 : vector<8x128xi1>, vector<8x128xf32>
    %139 = arith.index_cast %c2_i32 : i32 to index
    %c0_44 = arith.constant 0 : index
    %c0_45 = arith.constant 0 : index
    %140 = vector.load %arg6[%139, %c0_44, %c0_45] : memref<8x8x128xf32, #tpu.memory_space<vmem>>, vector<1x8x128xf32>
    %141 = vector.shape_cast %140 : vector<1x8x128xf32> to vector<8x128xf32>
    %142 = vector.shape_cast %138 : vector<8x128xf32> to vector<1x8x128xf32>
    tpu.vector_store %arg6[%139, %c0_44, %c0_45], %142 {strides = array<i32>} : memref<8x8x128xf32, #tpu.memory_space<vmem>>, vector<1x8x128xf32>,
    %143 = vector.shape_cast %134 : vector<8x1xi1> to vector<8x1xi1>
    %144 = vector.broadcast %143 : vector<8x1xi1> to vector<8x128xi1>
    %145 = arith.select %144, %131, %100 : vector<8x128xi1>, vector<8x128xf32>
    %c3_i32 = arith.constant 3 : i32
    %c8_i32_46 = arith.constant 8 : i32
    %146 = arith.muli %c3_i32, %c8_i32_46 : i32
    %147 = arith.index_cast %146 : i32 to index
    %c0_47 = arith.constant 0 : index
    %148 = vector.load %arg7[%147, %c0_47] : memref<64x384xf32, #tpu.memory_space<vmem>>, vector<8x384xf32>
    %c0_48 = arith.constant 0 : index
    %c0_49 = arith.constant 0 : index
    %149 = vector.load %arg5[%c0_48, %c0_49] : memref<128x384xf32, #tpu.memory_space<vmem>>, vector<128x384xf32>
    %cst_50 = arith.constant dense<0.000000e+00> : vector<8x384xf32>
    %150 = tpu.matmul %145, %149, %cst_50 {dimension_numbers = #tpu.dot_dimension_numbers<[1], [0], [0], [1], [0, 0, 1, 1], [], []>} : vector<8x128xf32>, vector<128x384xf32>, vector<8x384xf32> -> vector<8x384xf32>
    %151 = vector.extract_strided_slice %148 {offsets = [0, 0], sizes = [8, 128], strides = [1, 1]} : vector<8x384xf32> to vector<8x128xf32>
    %152 = vector.extract_strided_slice %150 {offsets = [0, 0], sizes = [8, 128], strides = [1, 1]} : vector<8x384xf32> to vector<8x128xf32>
    %153 = arith.addf %151, %152 : vector<8x128xf32>
    %154 = arith.negf %153 : vector<8x128xf32>
    %155 = math.exp %154 : vector<8x128xf32>
    %cst_51 = arith.constant 1.000000e+00 : f32
    %156 = vector.broadcast %cst_51 : f32 to vector<8x128xf32>
    %157 = arith.addf %156, %155 : vector<8x128xf32>
    %158 = arith.divf %156, %157 : vector<8x128xf32>
    %159 = vector.extract_strided_slice %148 {offsets = [0, 128], sizes = [8, 128], strides = [1, 1]} : vector<8x384xf32> to vector<8x128xf32>
    %160 = vector.extract_strided_slice %150 {offsets = [0, 128], sizes = [8, 128], strides = [1, 1]} : vector<8x384xf32> to vector<8x128xf32>
    %161 = arith.addf %159, %160 : vector<8x128xf32>
    %162 = arith.negf %161 : vector<8x128xf32>
    %163 = math.exp %162 : vector<8x128xf32>
    %cst_52 = arith.constant 1.000000e+00 : f32
    %164 = vector.broadcast %cst_52 : f32 to vector<8x128xf32>
    %165 = arith.addf %164, %163 : vector<8x128xf32>
    %166 = arith.divf %164, %165 : vector<8x128xf32>
    %167 = vector.extract_strided_slice %148 {offsets = [0, 256], sizes = [8, 128], strides = [1, 1]} : vector<8x384xf32> to vector<8x128xf32>
    %168 = vector.extract_strided_slice %150 {offsets = [0, 256], sizes = [8, 128], strides = [1, 1]} : vector<8x384xf32> to vector<8x128xf32>
    %169 = arith.mulf %158, %168 : vector<8x128xf32>
    %170 = arith.addf %167, %169 : vector<8x128xf32>
    %171 = math.tanh %170 : vector<8x128xf32>
    %cst_53 = arith.constant 1.000000e+00 : f32
    %172 = vector.broadcast %cst_53 : f32 to vector<8x128xf32>
    %173 = arith.subf %172, %166 : vector<8x128xf32>
    %174 = arith.mulf %173, %171 : vector<8x128xf32>
    %175 = arith.mulf %166, %145 : vector<8x128xf32>
    %176 = arith.addf %174, %175 : vector<8x128xf32>
    %177 = arith.addi %9, %c3_i32 : i32
    %178 = vector.broadcast %177 : i32 to vector<8x1xi32>
    %179 = arith.cmpi slt, %178, %8 : vector<8x1xi32>
    %cst_54 = arith.constant 0.000000e+00 : f32
    %180 = vector.shape_cast %179 : vector<8x1xi1> to vector<8x1xi1>
    %181 = vector.broadcast %180 : vector<8x1xi1> to vector<8x128xi1>
    %182 = vector.broadcast %cst_54 : f32 to vector<8x128xf32>
    %183 = arith.select %181, %176, %182 : vector<8x128xi1>, vector<8x128xf32>
    %184 = arith.index_cast %c3_i32 : i32 to index
    %c0_55 = arith.constant 0 : index
    %c0_56 = arith.constant 0 : index
    %185 = vector.load %arg6[%184, %c0_55, %c0_56] : memref<8x8x128xf32, #tpu.memory_space<vmem>>, vector<1x8x128xf32>
    %186 = vector.shape_cast %185 : vector<1x8x128xf32> to vector<8x128xf32>
    %187 = vector.shape_cast %183 : vector<8x128xf32> to vector<1x8x128xf32>
    tpu.vector_store %arg6[%184, %c0_55, %c0_56], %187 {strides = array<i32>} : memref<8x8x128xf32, #tpu.memory_space<vmem>>, vector<1x8x128xf32>,
    %188 = vector.shape_cast %179 : vector<8x1xi1> to vector<8x1xi1>
    %189 = vector.broadcast %188 : vector<8x1xi1> to vector<8x128xi1>
    %190 = arith.select %189, %176, %145 : vector<8x128xi1>, vector<8x128xf32>
    %c4_i32 = arith.constant 4 : i32
    %c8_i32_57 = arith.constant 8 : i32
    %191 = arith.muli %c4_i32, %c8_i32_57 : i32
    %192 = arith.index_cast %191 : i32 to index
    %c0_58 = arith.constant 0 : index
    %193 = vector.load %arg7[%192, %c0_58] : memref<64x384xf32, #tpu.memory_space<vmem>>, vector<8x384xf32>
    %c0_59 = arith.constant 0 : index
    %c0_60 = arith.constant 0 : index
    %194 = vector.load %arg5[%c0_59, %c0_60] : memref<128x384xf32, #tpu.memory_space<vmem>>, vector<128x384xf32>
    %cst_61 = arith.constant dense<0.000000e+00> : vector<8x384xf32>
    %195 = tpu.matmul %190, %194, %cst_61 {dimension_numbers = #tpu.dot_dimension_numbers<[1], [0], [0], [1], [0, 0, 1, 1], [], []>} : vector<8x128xf32>, vector<128x384xf32>, vector<8x384xf32> -> vector<8x384xf32>
    %196 = vector.extract_strided_slice %193 {offsets = [0, 0], sizes = [8, 128], strides = [1, 1]} : vector<8x384xf32> to vector<8x128xf32>
    %197 = vector.extract_strided_slice %195 {offsets = [0, 0], sizes = [8, 128], strides = [1, 1]} : vector<8x384xf32> to vector<8x128xf32>
    %198 = arith.addf %196, %197 : vector<8x128xf32>
    %199 = arith.negf %198 : vector<8x128xf32>
    %200 = math.exp %199 : vector<8x128xf32>
    %cst_62 = arith.constant 1.000000e+00 : f32
    %201 = vector.broadcast %cst_62 : f32 to vector<8x128xf32>
    %202 = arith.addf %201, %200 : vector<8x128xf32>
    %203 = arith.divf %201, %202 : vector<8x128xf32>
    %204 = vector.extract_strided_slice %193 {offsets = [0, 128], sizes = [8, 128], strides = [1, 1]} : vector<8x384xf32> to vector<8x128xf32>
    %205 = vector.extract_strided_slice %195 {offsets = [0, 128], sizes = [8, 128], strides = [1, 1]} : vector<8x384xf32> to vector<8x128xf32>
    %206 = arith.addf %204, %205 : vector<8x128xf32>
    %207 = arith.negf %206 : vector<8x128xf32>
    %208 = math.exp %207 : vector<8x128xf32>
    %cst_63 = arith.constant 1.000000e+00 : f32
    %209 = vector.broadcast %cst_63 : f32 to vector<8x128xf32>
    %210 = arith.addf %209, %208 : vector<8x128xf32>
    %211 = arith.divf %209, %210 : vector<8x128xf32>
    %212 = vector.extract_strided_slice %193 {offsets = [0, 256], sizes = [8, 128], strides = [1, 1]} : vector<8x384xf32> to vector<8x128xf32>
    %213 = vector.extract_strided_slice %195 {offsets = [0, 256], sizes = [8, 128], strides = [1, 1]} : vector<8x384xf32> to vector<8x128xf32>
    %214 = arith.mulf %203, %213 : vector<8x128xf32>
    %215 = arith.addf %212, %214 : vector<8x128xf32>
    %216 = math.tanh %215 : vector<8x128xf32>
    %cst_64 = arith.constant 1.000000e+00 : f32
    %217 = vector.broadcast %cst_64 : f32 to vector<8x128xf32>
    %218 = arith.subf %217, %211 : vector<8x128xf32>
    %219 = arith.mulf %218, %216 : vector<8x128xf32>
    %220 = arith.mulf %211, %190 : vector<8x128xf32>
    %221 = arith.addf %219, %220 : vector<8x128xf32>
    %222 = arith.addi %9, %c4_i32 : i32
    %223 = vector.broadcast %222 : i32 to vector<8x1xi32>
    %224 = arith.cmpi slt, %223, %8 : vector<8x1xi32>
    %cst_65 = arith.constant 0.000000e+00 : f32
    %225 = vector.shape_cast %224 : vector<8x1xi1> to vector<8x1xi1>
    %226 = vector.broadcast %225 : vector<8x1xi1> to vector<8x128xi1>
    %227 = vector.broadcast %cst_65 : f32 to vector<8x128xf32>
    %228 = arith.select %226, %221, %227 : vector<8x128xi1>, vector<8x128xf32>
    %229 = arith.index_cast %c4_i32 : i32 to index
    %c0_66 = arith.constant 0 : index
    %c0_67 = arith.constant 0 : index
    %230 = vector.load %arg6[%229, %c0_66, %c0_67] : memref<8x8x128xf32, #tpu.memory_space<vmem>>, vector<1x8x128xf32>
    %231 = vector.shape_cast %230 : vector<1x8x128xf32> to vector<8x128xf32>
    %232 = vector.shape_cast %228 : vector<8x128xf32> to vector<1x8x128xf32>
    tpu.vector_store %arg6[%229, %c0_66, %c0_67], %232 {strides = array<i32>} : memref<8x8x128xf32, #tpu.memory_space<vmem>>, vector<1x8x128xf32>,
    %233 = vector.shape_cast %224 : vector<8x1xi1> to vector<8x1xi1>
    %234 = vector.broadcast %233 : vector<8x1xi1> to vector<8x128xi1>
    %235 = arith.select %234, %221, %190 : vector<8x128xi1>, vector<8x128xf32>
    %c5_i32 = arith.constant 5 : i32
    %c8_i32_68 = arith.constant 8 : i32
    %236 = arith.muli %c5_i32, %c8_i32_68 : i32
    %237 = arith.index_cast %236 : i32 to index
    %c0_69 = arith.constant 0 : index
    %238 = vector.load %arg7[%237, %c0_69] : memref<64x384xf32, #tpu.memory_space<vmem>>, vector<8x384xf32>
    %c0_70 = arith.constant 0 : index
    %c0_71 = arith.constant 0 : index
    %239 = vector.load %arg5[%c0_70, %c0_71] : memref<128x384xf32, #tpu.memory_space<vmem>>, vector<128x384xf32>
    %cst_72 = arith.constant dense<0.000000e+00> : vector<8x384xf32>
    %240 = tpu.matmul %235, %239, %cst_72 {dimension_numbers = #tpu.dot_dimension_numbers<[1], [0], [0], [1], [0, 0, 1, 1], [], []>} : vector<8x128xf32>, vector<128x384xf32>, vector<8x384xf32> -> vector<8x384xf32>
    %241 = vector.extract_strided_slice %238 {offsets = [0, 0], sizes = [8, 128], strides = [1, 1]} : vector<8x384xf32> to vector<8x128xf32>
    %242 = vector.extract_strided_slice %240 {offsets = [0, 0], sizes = [8, 128], strides = [1, 1]} : vector<8x384xf32> to vector<8x128xf32>
    %243 = arith.addf %241, %242 : vector<8x128xf32>
    %244 = arith.negf %243 : vector<8x128xf32>
    %245 = math.exp %244 : vector<8x128xf32>
    %cst_73 = arith.constant 1.000000e+00 : f32
    %246 = vector.broadcast %cst_73 : f32 to vector<8x128xf32>
    %247 = arith.addf %246, %245 : vector<8x128xf32>
    %248 = arith.divf %246, %247 : vector<8x128xf32>
    %249 = vector.extract_strided_slice %238 {offsets = [0, 128], sizes = [8, 128], strides = [1, 1]} : vector<8x384xf32> to vector<8x128xf32>
    %250 = vector.extract_strided_slice %240 {offsets = [0, 128], sizes = [8, 128], strides = [1, 1]} : vector<8x384xf32> to vector<8x128xf32>
    %251 = arith.addf %249, %250 : vector<8x128xf32>
    %252 = arith.negf %251 : vector<8x128xf32>
    %253 = math.exp %252 : vector<8x128xf32>
    %cst_74 = arith.constant 1.000000e+00 : f32
    %254 = vector.broadcast %cst_74 : f32 to vector<8x128xf32>
    %255 = arith.addf %254, %253 : vector<8x128xf32>
    %256 = arith.divf %254, %255 : vector<8x128xf32>
    %257 = vector.extract_strided_slice %238 {offsets = [0, 256], sizes = [8, 128], strides = [1, 1]} : vector<8x384xf32> to vector<8x128xf32>
    %258 = vector.extract_strided_slice %240 {offsets = [0, 256], sizes = [8, 128], strides = [1, 1]} : vector<8x384xf32> to vector<8x128xf32>
    %259 = arith.mulf %248, %258 : vector<8x128xf32>
    %260 = arith.addf %257, %259 : vector<8x128xf32>
    %261 = math.tanh %260 : vector<8x128xf32>
    %cst_75 = arith.constant 1.000000e+00 : f32
    %262 = vector.broadcast %cst_75 : f32 to vector<8x128xf32>
    %263 = arith.subf %262, %256 : vector<8x128xf32>
    %264 = arith.mulf %263, %261 : vector<8x128xf32>
    %265 = arith.mulf %256, %235 : vector<8x128xf32>
    %266 = arith.addf %264, %265 : vector<8x128xf32>
    %267 = arith.addi %9, %c5_i32 : i32
    %268 = vector.broadcast %267 : i32 to vector<8x1xi32>
    %269 = arith.cmpi slt, %268, %8 : vector<8x1xi32>
    %cst_76 = arith.constant 0.000000e+00 : f32
    %270 = vector.shape_cast %269 : vector<8x1xi1> to vector<8x1xi1>
    %271 = vector.broadcast %270 : vector<8x1xi1> to vector<8x128xi1>
    %272 = vector.broadcast %cst_76 : f32 to vector<8x128xf32>
    %273 = arith.select %271, %266, %272 : vector<8x128xi1>, vector<8x128xf32>
    %274 = arith.index_cast %c5_i32 : i32 to index
    %c0_77 = arith.constant 0 : index
    %c0_78 = arith.constant 0 : index
    %275 = vector.load %arg6[%274, %c0_77, %c0_78] : memref<8x8x128xf32, #tpu.memory_space<vmem>>, vector<1x8x128xf32>
    %276 = vector.shape_cast %275 : vector<1x8x128xf32> to vector<8x128xf32>
    %277 = vector.shape_cast %273 : vector<8x128xf32> to vector<1x8x128xf32>
    tpu.vector_store %arg6[%274, %c0_77, %c0_78], %277 {strides = array<i32>} : memref<8x8x128xf32, #tpu.memory_space<vmem>>, vector<1x8x128xf32>,
    %278 = vector.shape_cast %269 : vector<8x1xi1> to vector<8x1xi1>
    %279 = vector.broadcast %278 : vector<8x1xi1> to vector<8x128xi1>
    %280 = arith.select %279, %266, %235 : vector<8x128xi1>, vector<8x128xf32>
    %c6_i32 = arith.constant 6 : i32
    %c8_i32_79 = arith.constant 8 : i32
    %281 = arith.muli %c6_i32, %c8_i32_79 : i32
    %282 = arith.index_cast %281 : i32 to index
    %c0_80 = arith.constant 0 : index
    %283 = vector.load %arg7[%282, %c0_80] : memref<64x384xf32, #tpu.memory_space<vmem>>, vector<8x384xf32>
    %c0_81 = arith.constant 0 : index
    %c0_82 = arith.constant 0 : index
    %284 = vector.load %arg5[%c0_81, %c0_82] : memref<128x384xf32, #tpu.memory_space<vmem>>, vector<128x384xf32>
    %cst_83 = arith.constant dense<0.000000e+00> : vector<8x384xf32>
    %285 = tpu.matmul %280, %284, %cst_83 {dimension_numbers = #tpu.dot_dimension_numbers<[1], [0], [0], [1], [0, 0, 1, 1], [], []>} : vector<8x128xf32>, vector<128x384xf32>, vector<8x384xf32> -> vector<8x384xf32>
    %286 = vector.extract_strided_slice %283 {offsets = [0, 0], sizes = [8, 128], strides = [1, 1]} : vector<8x384xf32> to vector<8x128xf32>
    %287 = vector.extract_strided_slice %285 {offsets = [0, 0], sizes = [8, 128], strides = [1, 1]} : vector<8x384xf32> to vector<8x128xf32>
    %288 = arith.addf %286, %287 : vector<8x128xf32>
    %289 = arith.negf %288 : vector<8x128xf32>
    %290 = math.exp %289 : vector<8x128xf32>
    %cst_84 = arith.constant 1.000000e+00 : f32
    %291 = vector.broadcast %cst_84 : f32 to vector<8x128xf32>
    %292 = arith.addf %291, %290 : vector<8x128xf32>
    %293 = arith.divf %291, %292 : vector<8x128xf32>
    %294 = vector.extract_strided_slice %283 {offsets = [0, 128], sizes = [8, 128], strides = [1, 1]} : vector<8x384xf32> to vector<8x128xf32>
    %295 = vector.extract_strided_slice %285 {offsets = [0, 128], sizes = [8, 128], strides = [1, 1]} : vector<8x384xf32> to vector<8x128xf32>
    %296 = arith.addf %294, %295 : vector<8x128xf32>
    %297 = arith.negf %296 : vector<8x128xf32>
    %298 = math.exp %297 : vector<8x128xf32>
    %cst_85 = arith.constant 1.000000e+00 : f32
    %299 = vector.broadcast %cst_85 : f32 to vector<8x128xf32>
    %300 = arith.addf %299, %298 : vector<8x128xf32>
    %301 = arith.divf %299, %300 : vector<8x128xf32>
    %302 = vector.extract_strided_slice %283 {offsets = [0, 256], sizes = [8, 128], strides = [1, 1]} : vector<8x384xf32> to vector<8x128xf32>
    %303 = vector.extract_strided_slice %285 {offsets = [0, 256], sizes = [8, 128], strides = [1, 1]} : vector<8x384xf32> to vector<8x128xf32>
    %304 = arith.mulf %293, %303 : vector<8x128xf32>
    %305 = arith.addf %302, %304 : vector<8x128xf32>
    %306 = math.tanh %305 : vector<8x128xf32>
    %cst_86 = arith.constant 1.000000e+00 : f32
    %307 = vector.broadcast %cst_86 : f32 to vector<8x128xf32>
    %308 = arith.subf %307, %301 : vector<8x128xf32>
    %309 = arith.mulf %308, %306 : vector<8x128xf32>
    %310 = arith.mulf %301, %280 : vector<8x128xf32>
    %311 = arith.addf %309, %310 : vector<8x128xf32>
    %312 = arith.addi %9, %c6_i32 : i32
    %313 = vector.broadcast %312 : i32 to vector<8x1xi32>
    %314 = arith.cmpi slt, %313, %8 : vector<8x1xi32>
    %cst_87 = arith.constant 0.000000e+00 : f32
    %315 = vector.shape_cast %314 : vector<8x1xi1> to vector<8x1xi1>
    %316 = vector.broadcast %315 : vector<8x1xi1> to vector<8x128xi1>
    %317 = vector.broadcast %cst_87 : f32 to vector<8x128xf32>
    %318 = arith.select %316, %311, %317 : vector<8x128xi1>, vector<8x128xf32>
    %319 = arith.index_cast %c6_i32 : i32 to index
    %c0_88 = arith.constant 0 : index
    %c0_89 = arith.constant 0 : index
    %320 = vector.load %arg6[%319, %c0_88, %c0_89] : memref<8x8x128xf32, #tpu.memory_space<vmem>>, vector<1x8x128xf32>
    %321 = vector.shape_cast %320 : vector<1x8x128xf32> to vector<8x128xf32>
    %322 = vector.shape_cast %318 : vector<8x128xf32> to vector<1x8x128xf32>
    tpu.vector_store %arg6[%319, %c0_88, %c0_89], %322 {strides = array<i32>} : memref<8x8x128xf32, #tpu.memory_space<vmem>>, vector<1x8x128xf32>,
    %323 = vector.shape_cast %314 : vector<8x1xi1> to vector<8x1xi1>
    %324 = vector.broadcast %323 : vector<8x1xi1> to vector<8x128xi1>
    %325 = arith.select %324, %311, %280 : vector<8x128xi1>, vector<8x128xf32>
    %c7_i32 = arith.constant 7 : i32
    %c8_i32_90 = arith.constant 8 : i32
    %326 = arith.muli %c7_i32, %c8_i32_90 : i32
    %327 = arith.index_cast %326 : i32 to index
    %c0_91 = arith.constant 0 : index
    %328 = vector.load %arg7[%327, %c0_91] : memref<64x384xf32, #tpu.memory_space<vmem>>, vector<8x384xf32>
    %c0_92 = arith.constant 0 : index
    %c0_93 = arith.constant 0 : index
    %329 = vector.load %arg5[%c0_92, %c0_93] : memref<128x384xf32, #tpu.memory_space<vmem>>, vector<128x384xf32>
    %cst_94 = arith.constant dense<0.000000e+00> : vector<8x384xf32>
    %330 = tpu.matmul %325, %329, %cst_94 {dimension_numbers = #tpu.dot_dimension_numbers<[1], [0], [0], [1], [0, 0, 1, 1], [], []>} : vector<8x128xf32>, vector<128x384xf32>, vector<8x384xf32> -> vector<8x384xf32>
    %331 = vector.extract_strided_slice %328 {offsets = [0, 0], sizes = [8, 128], strides = [1, 1]} : vector<8x384xf32> to vector<8x128xf32>
    %332 = vector.extract_strided_slice %330 {offsets = [0, 0], sizes = [8, 128], strides = [1, 1]} : vector<8x384xf32> to vector<8x128xf32>
    %333 = arith.addf %331, %332 : vector<8x128xf32>
    %334 = arith.negf %333 : vector<8x128xf32>
    %335 = math.exp %334 : vector<8x128xf32>
    %cst_95 = arith.constant 1.000000e+00 : f32
    %336 = vector.broadcast %cst_95 : f32 to vector<8x128xf32>
    %337 = arith.addf %336, %335 : vector<8x128xf32>
    %338 = arith.divf %336, %337 : vector<8x128xf32>
    %339 = vector.extract_strided_slice %328 {offsets = [0, 128], sizes = [8, 128], strides = [1, 1]} : vector<8x384xf32> to vector<8x128xf32>
    %340 = vector.extract_strided_slice %330 {offsets = [0, 128], sizes = [8, 128], strides = [1, 1]} : vector<8x384xf32> to vector<8x128xf32>
    %341 = arith.addf %339, %340 : vector<8x128xf32>
    %342 = arith.negf %341 : vector<8x128xf32>
    %343 = math.exp %342 : vector<8x128xf32>
    %cst_96 = arith.constant 1.000000e+00 : f32
    %344 = vector.broadcast %cst_96 : f32 to vector<8x128xf32>
    %345 = arith.addf %344, %343 : vector<8x128xf32>
    %346 = arith.divf %344, %345 : vector<8x128xf32>
    %347 = vector.extract_strided_slice %328 {offsets = [0, 256], sizes = [8, 128], strides = [1, 1]} : vector<8x384xf32> to vector<8x128xf32>
    %348 = vector.extract_strided_slice %330 {offsets = [0, 256], sizes = [8, 128], strides = [1, 1]} : vector<8x384xf32> to vector<8x128xf32>
    %349 = arith.mulf %338, %348 : vector<8x128xf32>
    %350 = arith.addf %347, %349 : vector<8x128xf32>
    %351 = math.tanh %350 : vector<8x128xf32>
    %cst_97 = arith.constant 1.000000e+00 : f32
    %352 = vector.broadcast %cst_97 : f32 to vector<8x128xf32>
    %353 = arith.subf %352, %346 : vector<8x128xf32>
    %354 = arith.mulf %353, %351 : vector<8x128xf32>
    %355 = arith.mulf %346, %325 : vector<8x128xf32>
    %356 = arith.addf %354, %355 : vector<8x128xf32>
    %357 = arith.addi %9, %c7_i32 : i32
    %358 = vector.broadcast %357 : i32 to vector<8x1xi32>
    %359 = arith.cmpi slt, %358, %8 : vector<8x1xi32>
    %cst_98 = arith.constant 0.000000e+00 : f32
    %360 = vector.shape_cast %359 : vector<8x1xi1> to vector<8x1xi1>
    %361 = vector.broadcast %360 : vector<8x1xi1> to vector<8x128xi1>
    %362 = vector.broadcast %cst_98 : f32 to vector<8x128xf32>
    %363 = arith.select %361, %356, %362 : vector<8x128xi1>, vector<8x128xf32>
    %364 = arith.index_cast %c7_i32 : i32 to index
    %c0_99 = arith.constant 0 : index
    %c0_100 = arith.constant 0 : index
    %365 = vector.load %arg6[%364, %c0_99, %c0_100] : memref<8x8x128xf32, #tpu.memory_space<vmem>>, vector<1x8x128xf32>
    %366 = vector.shape_cast %365 : vector<1x8x128xf32> to vector<8x128xf32>
    %367 = vector.shape_cast %363 : vector<8x128xf32> to vector<1x8x128xf32>
    tpu.vector_store %arg6[%364, %c0_99, %c0_100], %367 {strides = array<i32>} : memref<8x8x128xf32, #tpu.memory_space<vmem>>, vector<1x8x128xf32>,
    %368 = vector.shape_cast %359 : vector<8x1xi1> to vector<8x1xi1>
    %369 = vector.broadcast %368 : vector<8x1xi1> to vector<8x128xi1>
    %370 = arith.select %369, %356, %325 : vector<8x128xi1>, vector<8x128xf32>
    %c8_i32_101 = arith.constant 8 : i32
    %c0_102 = arith.constant 0 : index
    %c0_103 = arith.constant 0 : index
    %371 = vector.load %arg8[%c0_102, %c0_103] : memref<8x128xf32, #tpu.memory_space<vmem>>, vector<8x128xf32>
    tpu.vector_store %arg8[%c0_102, %c0_103], %370 {strides = array<i32>} : memref<8x128xf32, #tpu.memory_space<vmem>>, vector<8x128xf32>,
    return
  }
  func.func @transform_0(%arg0: i32, %arg1: i32) -> (i32, i32, i32, i32) {
    %c0_i32 = arith.constant 0 : i32
    %c0_i32_0 = arith.constant 0 : i32
    %c0_i32_1 = arith.constant 0 : i32
    return %arg1, %arg0, %c0_i32, %c0_i32_0 : i32, i32, i32, i32
  }
  func.func @transform_1(%arg0: i32, %arg1: i32) -> (i32, i32) {
    %c0_i32 = arith.constant 0 : i32
    %c0_i32_0 = arith.constant 0 : i32
    return %arg0, %c0_i32 : i32, i32
  }
  func.func @transform_2(%arg0: i32, %arg1: i32) -> (i32, i32) {
    %c0_i32 = arith.constant 0 : i32
    %c0_i32_0 = arith.constant 0 : i32
    %c0_i32_1 = arith.constant 0 : i32
    return %c0_i32, %c0_i32_0 : i32, i32
  }
  func.func @transform_3(%arg0: i32, %arg1: i32) -> (i32, i32) {
    %c0_i32 = arith.constant 0 : i32
    %c0_i32_0 = arith.constant 0 : i32
    %c0_i32_1 = arith.constant 0 : i32
    return %c0_i32, %c0_i32_0 : i32, i32
  }
  func.func @transform_4(%arg0: i32, %arg1: i32) -> (i32, i32, i32) {
    %c0_i32 = arith.constant 0 : i32
    %c0_i32_0 = arith.constant 0 : i32
    return %arg1, %arg0, %c0_i32 : i32, i32, i32
  }
}

</mosaic_0001>

<bundles_post_ra>
// kernel: tpu_custom_call.1
= control target key start
LH: loop header
LB: loop body
LE: loop exit
PB: predicated region body
PF: predicated region fallthrough
CT: control target
= control target key end

     0   :  { %9 = vsyncpa [#allocation5], 0  ;;  %s3731_s0 = inlined_call_operand.vmem [shape: f32[1,1,64,32], index: 0, kind: input, shape index: {}]   ;;  %s3732_s1 = inlined_call_operand.vmem [shape: s32[8,1], index: 1, kind: input, shape index: {}]   ;;  %s3733_s2 = inlined_call_operand.vmem [shape: f32[32,384], index: 2, kind: input, shape index: {}]   ;;  %s3734_s3 = inlined_call_operand.hbm [shape: f32[128,384], index: 3, kind: input, shape index: {}]   ;;  %s3735_s4 = inlined_call_operand.hbm [shape: f32[8,8,128], index: 4, kind: output, shape index: {}]  }
   0x1   :  { %10 = vsyncpa [#allocation6], 0  ;;  %s2768_s15 = smov [#allocation4]  }
   0x2   :  { %s22_s16 = sshll.u32 %s2768_s15, 4  ;;  %s23_s16 = int_to_ptr.vmem [resolvable:$true] %s22_s16 }
   0x3   :  { %s2732_s17 = scalar_lea.vmem %s23_s16, 6144  ;;  %p2737_p1 = scmp.lt.s32.totalorder %s23_s16, %s23_s16 }
   0x4   :  { %p2733_p0 = scmp.ne.s32.totalorder %s23_s16, %s2732_s17  ;;  %p2738_p2 = scmp.lt.s32.totalorder %s2732_s17, %s2732_s17 }
   0x6   :  { %p2739_p3 = por %p2738_p2, %p2737_p1 }
   0x8   :  { %p2740_p4 = pnand %p2739_p3, %p2733_p0 }
   0xa   :  { %2743 = shalt.err (!%p2740_p4)
}
   0xb   :  { %s2769_s18 = smov 384   ;;  %s2770_s19 = smov 24  }
   0xc   :  { %28 = dma.hbm_to_vmem [thread:$0]  %s3734_s3, 6144, %s23_s16, [#allocation5], %s2769_s18, %s2769_s18, %s2770_s19  }
   0xd   :  { %2764 = dma.done.wait [#allocation5], 6144  }
   0xe   :  { %2765 = vsyncadd [#allocation5], 4294961152  ;;  %v3738_v0 = vmov 0.0   ;;  %v3736_v1 = vmov 0   ;;  %v55_v2 = vld [vmem:[%s3733_s2 + $0x50] sm:$0xff]  ;;  %v54_v3 = vld [vmem:[%s3733_s2 + $0x48] sm:$0xff] }
   0xf   :  { %146 = vmatprep.mubr.f32.mxu0 %v3738_v0  ;;  %2642 = vset.pattern.permute.xlu0 %v3736_v1  ;;  %v52_v4 = vld [vmem:[%s3733_s2 + $0x38] sm:$0xff]  ;;  %v51_v5 = vld [vmem:[%s3733_s2 + $0x30] sm:$0xff]  ;;  %v49_v6 = vld [vmem:[%s3733_s2 + $0x20] sm:$0xff]  ;;  %vm57_vm0 = vcmask 261120   ;;  %vm2773_vm5 = vmmov 0  }
  0x10   :  { %2643 = vset.pattern.permute.xlu1 %v3736_v1  ;;  %106 = vmatprep.subr.mxu0 %v55_v2  ;;  %v37_v7 = vld [vmem:[%s3731_s0] sm:$0xff]  ;;  %v48_v8 = vld [vmem:[%s3733_s2 + $0x18] sm:$0xff]  ;;  %v46_v9 = vld [vmem:[%s3733_s2 + $0x8] sm:$0xff] }
  0x11   :  { %107 = vmatpush1.msra.mxu0 %v54_v3  ;;  %2341 = vmatprep.mubr.msk.f32.mxu1 %vm57_vm0, %v37_v7  ;;  %v45_v10 = vld [vmem:[%s3733_s2] sm:$0xff]  ;;  %v2836_v11 = vld [vmem:[#allocation4 + $0x170] sm:$0xff]  ;;  %v2838_v12 = vld [vmem:[#allocation4 + $0x168] sm:$0xff] }
  0x12   :  { %108 = vmatprep.subr.mxu0 %v52_v4  ;;  %v2840_v13 = vld [vmem:[#allocation4 + $0x158] sm:$0xff]  ;;  %v2844_v14 = vld [vmem:[#allocation4 + $0x150] sm:$0xff]  ;;  %v2851_v15 = vld [vmem:[%s3731_s0 + $0x8] sm:$0xff] }
  0x13   :  { %109 = vmatpush1.msra.mxu0 %v51_v5  ;;  %v2853_v16 = vld [vmem:[#allocation4 + $0x140] sm:$0xff]  ;;  %v2856_v17 = vld [vmem:[#allocation4 + $0x138] sm:$0xff]  ;;  %v2859_v18 = vld [vmem:[#allocation4 + $0x128] sm:$0xff] }
  0x14   :  { %110 = vmatprep.subr.mxu0 %v49_v6  ;;  %v2864_v19 = vld [vmem:[#allocation4 + $0x120] sm:$0xff]  ;;  %v56_v20 = vld [vmem:[%s3733_s2 + $0x58] sm:$0xff]  ;;  %v2874_v21 = vld [vmem:[%s3731_s0 + $0x10] sm:$0xff] }
  0x15   :  { %111 = vmatpush1.msra.mxu0 %v48_v8  ;;  %v2876_v22 = vld [vmem:[#allocation4 + $0x110] sm:$0xff]  ;;  %v2879_v23 = vld [vmem:[#allocation4 + $0x108] sm:$0xff]  ;;  %2333 = vmatprep.subr.mxu1 %v56_v20  ;;  %v2882_v24 = vld [vmem:[#allocation4 + $0xf8] sm:$0xff] }
  0x16   :  { %112 = vmatprep.subr.mxu0 %v46_v9  ;;  %2334 = vmatpush3.msra.mxu1 %v56_v20  ;;  %v53_v25 = vld [vmem:[%s3733_s2 + $0x40] sm:$0xff]  ;;  %v2890_v26 = vld [vmem:[#allocation4 + $0xf0] sm:$0xff]  ;;  %v2897_v27 = vld [vmem:[%s3731_s0 + $0x18] sm:$0xff] }
  0x17   :  { %113 = vmatpush1.msra.mxu0 %v45_v10  ;;  %v2899_v28 = vld [vmem:[#allocation4 + $0xe0] sm:$0xff]  ;;  %v2902_v29 = vld [vmem:[#allocation4 + $0xd8] sm:$0xff]  ;;  %2335 = vmatprep.subr.mxu1 %v53_v25  ;;  %v2905_v30 = vld [vmem:[#allocation4 + $0xc8] sm:$0xff] }
  0x18   :  { %2143 = vmatmul.mubr.msk.f32.vlgmr.msra.gmra.mxu0 %vm57_vm0, %v37_v7  ;;  %378 = vmatprep.subr.mxu0 %v2836_v11  ;;  %v50_v31 = vld [vmem:[%s3733_s2 + $0x28] sm:$0xff]  ;;  %v2913_v32 = vld [vmem:[#allocation4 + $0xc0] sm:$0xff]  ;;  %v2922_v34 = vld [vmem:[#allocation4 + $0xb0] sm:$0xff] }
  0x19   :  { %379 = vmatpush1.msra.mxu0 %v2838_v12  ;;  %152 = vmatprep.mubr.f32.mxu0 %v3738_v0  ;;  %v2920_v33 = vld [vmem:[%s3731_s0 + $0x20] sm:$0xff]  ;;  %v2925_v35 = vld [vmem:[#allocation4 + $0xa8] sm:$0xff]  ;;  %v2928_v36 = vld [vmem:[#allocation4 + $0x98] sm:$0xff] }
  0x1a   :  { %380 = vmatprep.subr.mxu0 %v2840_v13  ;;  %2336 = vmatpush3.msra.mxu1 %v53_v25  ;;  %v47_v37 = vld [vmem:[%s3733_s2 + $0x10] sm:$0xff]  ;;  %v2943_v39 = vld [vmem:[%s3731_s0 + $0x28] sm:$0xff]  ;;  %v2945_v40 = vld [vmem:[#allocation4 + $0x80] sm:$0xff] }
  0x1b   :  { %381 = vmatpush1.msra.mxu0 %v2844_v14  ;;  %2337 = vmatprep.subr.mxu1 %v50_v31  ;;  %v2936_v38 = vld [vmem:[#allocation4 + $0x90] sm:$0xff]  ;;  %v2948_v41 = vld [vmem:[#allocation4 + $0x78] sm:$0xff]  ;;  %v2951_v42 = vld [vmem:[#allocation4 + $0x68] sm:$0xff] }
  0x1c   :  { %2144 = vmatmul.mubr.msk.f32.gmra.mxu0 %vm57_vm0, %v2851_v15  ;;  %382 = vmatprep.subr.mxu0 %v2853_v16  ;;  %v2956_v43 = vld [vmem:[#allocation4 + $0x60] sm:$0xff]  ;;  %v43_v44 = vld [vmem:[%s3731_s0 + $0x30] sm:$0xff]  ;;  %v2966_v46 = vld [vmem:[#allocation4 + $0x48] sm:$0xff] }
  0x1d   :  { %383 = vmatpush1.msra.mxu0 %v2856_v17  ;;  %158 = vmatprep.mubr.f32.mxu0 %v3738_v0  ;;  %v2963_v45 = vld [vmem:[#allocation4 + $0x50] sm:$0xff]  ;;  %v2970_v47 = vld [vmem:[#allocation4 + $0x38] sm:$0xff]  ;;  %v2985_v51 = vld [vmem:[#allocation4 + $0x20] sm:$0xff] }
  0x1e   :  { %384 = vmatprep.subr.mxu0 %v2859_v18  ;;  %2338 = vmatpush3.msra.mxu1 %v50_v31  ;;  %v2974_v48 = vld [vmem:[#allocation4 + $0x178] sm:$0xff]  ;;  %v2978_v49 = vld [vmem:[#allocation4 + $0x30] sm:$0xff]  ;;  %v2990_v52 = vld [vmem:[%s3732_s1] sm:$0xff] }
  0x1f   :  { %385 = vmatpush1.msra.mxu0 %v2864_v19  ;;  %2339 = vmatprep.subr.mxu1 %v47_v37  ;;  %v44_v50 = vld [vmem:[%s3731_s0 + $0x38] sm:$0xff]  ;;  %3749 = vst [vmem:[#allocation10_spill] sm:$0xff] %v2990_v52  ;;  %v2997_v54 = vld [vmem:[#allocation4 + $0x8] sm:$0xff]  ;;  %v3000_v55 = vld [vmem:[#allocation4 + $0x160] sm:$0xff]  ;;  %vm2161_vm1 = vcmp.gt.s32.totalorder %v2990_v52, 0  ;;  %vm2164_vm2 = vcmp.gt.s32.totalorder %v2990_v52, 1 }
  0x20   :  { %2145 = vmatmul.mubr.msk.f32.gmra.mxu0 %vm57_vm0, %v2874_v21  ;;  %386 = vmatprep.subr.mxu0 %v2876_v22  ;;  %v2993_v53 = vld [vmem:[#allocation4 + $0x18] sm:$0xff]  ;;  %v3004_v56 = vld [vmem:[#allocation4] sm:$0xff]  ;;  %v3009_v57 = vld [vmem:[#allocation4 + $0x148] sm:$0xff]  ;;  %v542_v59 = vsel %vm2161_vm1, 1, %v3736_v1  ;;  %v766_v62 = vsel %vm2164_vm2, 1, %v3736_v1  ;;  %vm2173_vm3 = vcmp.gt.s32.totalorder %v2990_v52, 4 }
  0x21   :  { %387 = vmatpush1.msra.mxu0 %v2879_v23  ;;  %164 = vmatprep.mubr.f32.mxu0 %v3738_v0  ;;  %v3015_v58 = vld [vmem:[#allocation4 + $0x130] sm:$0xff]  ;;  %v3022_v60 = vld [vmem:[#allocation4 + $0x118] sm:$0xff]  ;;  %v3028_v61 = vld [vmem:[#allocation4 + $0x100] sm:$0xff]  ;;  %v1441_v3 = vsel %vm2173_vm3, 1, %v3736_v1  ;;  %vm2179_vm4 = vcmp.gt.s32.totalorder %v2990_v52, 6  ;;  %s2774_s0 = smov [#allocation7]  }
  0x22   :  { %388 = vmatprep.subr.mxu0 %v2882_v24  ;;  %2340 = vmatpush3.msra.mxu1 %v47_v37  ;;  %v3038_v63 = vld [vmem:[#allocation4 + $0xe8] sm:$0xff]  ;;  %v3043_v2 = vld [vmem:[#allocation4 + $0xd0] sm:$0xff]  ;;  %v3052_v4 = vld [vmem:[#allocation4 + $0xb8] sm:$0xff]  ;;  %v1891_v6 = vsel %vm2179_vm4, 1, %v3736_v1  ;;  %s2131_s1 = sshll.u32 %s2774_s0, 4  ;;  %s2132_s1 = int_to_ptr.vmem [resolvable:$true] %s2131_s1 }
  0x23   :  { %389 = vmatpush1.msra.mxu0 %v2890_v26  ;;  %2353 = vmatprep.subr.mxu1 %v3738_v0  ;;  %v3057_v5 = vld [vmem:[#allocation4 + $0xa0] sm:$0xff]  ;;  %v3065_v7 = vld [vmem:[#allocation4 + $0x88] sm:$0xff]  ;;  %v3070_v8 = vld [vmem:[#allocation4 + $0x70] sm:$0xff]  ;;  %s2744_s9 = scalar_lea.vmem %s2132_s1, 1024  ;;  %p2749_p6 = scmp.lt.s32.totalorder %s2132_s1, %s2132_s1 }
  0x24   :  { %2146 = vmatmul.mubr.msk.f32.gmra.mxu0 %vm57_vm0, %v2897_v27  ;;  %390 = vmatprep.subr.mxu0 %v2899_v28  ;;  %v3076_v9 = vld [vmem:[#allocation4 + $0x58] sm:$0xff]  ;;  %v3082_v10 = vld [vmem:[#allocation4 + $0x40] sm:$0xff]  ;;  %v3094_v20 = vld [vmem:[#allocation4 + $0x10] sm:$0xff]  ;;  %p2745_p5 = scmp.ne.s32.totalorder %s2132_s1, %s2744_s9  ;;  %p2750_p7 = scmp.lt.s32.totalorder %s2744_s9, %s2744_s9 }
  0x25   :  { %391 = vmatpush1.msra.mxu0 %v2902_v29  ;;  %170 = vmatprep.mubr.f32.mxu0 %v3738_v0 }
  0x26   :  { %392 = vmatprep.subr.mxu0 %v2905_v30  ;;  %2342 = vmatmul.mubr.msk.f32.vlgmr.msra.gmra.mxu1 %vm57_vm0, %v2851_v15  ;;  %v3088_v15 = vld [vmem:[#allocation4 + $0x28] sm:$0xff]  ;;  %p2751_p8 = por %p2750_p7, %p2749_p6 }
  0x27   :  { %393 = vmatpush1.msra.mxu0 %v2913_v32  ;;  %2354 = vmatpush3.msra.mxu1 %v2974_v48 }
  0x28   :  { %2147 = vmatmul.mubr.msk.f32.gmra.mxu0 %vm57_vm0, %v2920_v33  ;;  %394 = vmatprep.subr.mxu0 %v2922_v34  ;;  %p2752_p9 = pnand %p2751_p8, %p2745_p5 }
  0x29   :  { %395 = vmatpush1.msra.mxu0 %v2925_v35  ;;  %176 = vmatprep.mubr.f32.mxu0 %v3738_v0 }
  0x2a   :  { %396 = vmatprep.subr.mxu0 %v2928_v36  ;;  %2355 = vmatprep.subr.mxu1 %v3738_v0 }
  0x2b   :  { %397 = vmatpush1.msra.mxu0 %v2936_v38  ;;  %2356 = vmatpush3.msra.mxu1 %v3000_v55 }
  0x2c   :  { %2148 = vmatmul.mubr.msk.f32.gmra.mxu0 %vm57_vm0, %v2943_v39  ;;  %398 = vmatprep.subr.mxu0 %v2945_v40 }
  0x2d   :  { %399 = vmatpush1.msra.mxu0 %v2948_v41  ;;  %182 = vmatprep.mubr.f32.mxu0 %v3738_v0 }
  0x2e   :  { %400 = vmatprep.subr.mxu0 %v2951_v42  ;;  %2357 = vmatprep.subr.mxu1 %v3738_v0 }
  0x2f   :  { %401 = vmatpush1.msra.mxu0 %v2956_v43  ;;  %2358 = vmatpush3.msra.mxu1 %v3009_v57 }
  0x30   :  { %2149 = vmatmul.mubr.msk.f32.gmra.mxu0 %vm57_vm0, %v43_v44  ;;  %402 = vmatprep.subr.mxu0 %v2963_v45 }
  0x31   :  { %403 = vmatpush1.msra.mxu0 %v2966_v46  ;;  %188 = vmatprep.mubr.f32.mxu0 %v3738_v0 }
  0x32   :  { %404 = vmatprep.subr.mxu0 %v2970_v47  ;;  %2359 = vmatprep.subr.mxu1 %v3738_v0 }
  0x33   :  { %405 = vmatpush1.msra.mxu0 %v2978_v49  ;;  %2344 = vmatprep.mubr.msk.f32.mxu1 %vm57_vm0, %v2874_v21 }
  0x34   :  { %2150 = vmatmul.mubr.msk.f32.gmra.mxu0 %vm57_vm0, %v44_v50  ;;  %406 = vmatprep.subr.mxu0 %v2985_v51 }
  0x35   :  { %407 = vmatpush1.msra.mxu0 %v2993_v53  ;;  %442 = vmatprep.mubr.f32.mxu0 %v3738_v0 }
  0x36   :  { %408 = vmatprep.subr.mxu0 %v2997_v54  ;;  %2360 = vmatpush3.msra.mxu1 %v3015_v58 }
  0x37   :  { %409 = vmatpush1.msra.mxu0 %v3004_v56  ;;  %544 = vperm.xlu0 %2642, %v542_v59  }
  0x38   :  { %443 = vmatmul.mubr.f32.vlgmr.msra.gmra.mxu0 %v3738_v0  ;;  %2361 = vmatprep.subr.mxu1 %v3738_v0 }
  0x39   :  { %2345 = vmatmul.mubr.msk.f32.gmra.mxu1 %vm57_vm0, %v2897_v27  ;;  %601 = vmatprep.subr.mxu0 %v2836_v11 }
  0x3a   :  { %2362 = vmatpush3.msra.mxu1 %v3022_v60  ;;  %2347 = vmatprep.mubr.msk.f32.mxu1 %vm57_vm0, %v2920_v33 }
  0x3b   :  { %2363 = vmatprep.subr.mxu1 %v3738_v0  ;;  %768 = vperm.xlu0 %2642, %v766_v62  }
  0x3c   :  { %2364 = vmatpush3.msra.mxu1 %v3028_v61  ;;  %602 = vmatpush1.msra.mxu0 %v2838_v12 }
  0x3d   :  { %2365 = vmatprep.subr.mxu1 %v3738_v0  ;;  %2348 = vmatmul.mubr.msk.f32.gmra.mxu1 %vm57_vm0, %v2943_v39 }
  0x3e   :  { %2366 = vmatpush3.msra.mxu1 %v3038_v63  ;;  %2350 = vmatprep.mubr.msk.f32.mxu1 %vm57_vm0, %v43_v44 }
  0x3f   :  { %2367 = vmatprep.subr.mxu1 %v3738_v0  ;;  %1443 = vperm.xlu0 %2642, %v1441_v3  }
  0x40   :  { %2368 = vmatpush3.msra.mxu1 %v3043_v2  ;;  %603 = vmatprep.subr.mxu0 %v2840_v13 }
  0x41   :  { %2369 = vmatprep.subr.mxu1 %v3738_v0  ;;  %2351 = vmatmul.mubr.msk.f32.gmra.mxu1 %vm57_vm0, %v44_v50 }
  0x42   :  { %2370 = vmatpush3.msra.mxu1 %v3052_v4  ;;  %2385 = vmatprep.mubr.msk.f32.mxu1 %vm2773_vm5, %v3738_v0 }
  0x43   :  { %2371 = vmatprep.subr.mxu1 %v3738_v0  ;;  %1893 = vperm.xlu0 %2642, %v1891_v6  }
  0x44   :  { %2372 = vmatpush3.msra.mxu1 %v3057_v5  ;;  %604 = vmatpush1.msra.mxu0 %v2844_v14 }
  0x45   :  { %2373 = vmatprep.subr.mxu1 %v3738_v0  ;;  %605 = vmatprep.subr.mxu0 %v2853_v16 }
  0x46   :  { %2374 = vmatpush3.msra.mxu1 %v3065_v7  ;;  %606 = vmatpush1.msra.mxu0 %v2856_v17 }
  0x47   :  { %2375 = vmatprep.subr.mxu1 %v3738_v0  ;;  %607 = vmatprep.subr.mxu0 %v2859_v18 }
  0x48   :  { %2376 = vmatpush3.msra.mxu1 %v3070_v8  ;;  %608 = vmatpush1.msra.mxu0 %v2864_v19 }
  0x49   :  { %2377 = vmatprep.subr.mxu1 %v3738_v0  ;;  %609 = vmatprep.subr.mxu0 %v2876_v22 }
  0x4a   :  { %2378 = vmatpush3.msra.mxu1 %v3076_v9  ;;  %610 = vmatpush1.msra.mxu0 %v2879_v23 }
  0x4b   :  { %2379 = vmatprep.subr.mxu1 %v3738_v0  ;;  %611 = vmatprep.subr.mxu0 %v2882_v24 }
  0x4c   :  { %2380 = vmatpush3.msra.mxu1 %v3082_v10  ;;  %612 = vmatpush1.msra.mxu0 %v2890_v26 }
  0x4d   :  { %2381 = vmatprep.subr.mxu1 %v3738_v0  ;;  %613 = vmatprep.subr.mxu0 %v2899_v28 }
  0x4e   :  { %2382 = vmatpush3.msra.mxu1 %v3088_v15  ;;  %614 = vmatpush1.msra.mxu0 %v2902_v29 }
  0x4f   :  { %2383 = vmatprep.subr.mxu1 %v3738_v0  ;;  %615 = vmatprep.subr.mxu0 %v2905_v30 }
  0x50   :  { %2384 = vmatpush3.msra.mxu1 %v3094_v20  ;;  %616 = vmatpush1.msra.mxu0 %v2913_v32 }
  0x51   :  { %2386 = vmatmul.mubr.f32.vlgmr.msra.gmra.mxu1 %v3738_v0  ;;  %2388 = vmatprep.subr.mxu1 %v3738_v0 }
  0x52   :  { %2389 = vmatpush3.msra.mxu1 %v2974_v48  ;;  %617 = vmatprep.subr.mxu0 %v2922_v34 }
  0x53   :  { %2390 = vmatprep.subr.mxu1 %v3738_v0  ;;  %618 = vmatpush1.msra.mxu0 %v2925_v35 }
  0x54   :  { %2391 = vmatpush3.msra.mxu1 %v3000_v55  ;;  %619 = vmatprep.subr.mxu0 %v2928_v36 }
  0x55   :  { %2392 = vmatprep.subr.mxu1 %v3738_v0  ;;  %620 = vmatpush1.msra.mxu0 %v2936_v38 }
  0x56   :  { %2393 = vmatpush3.msra.mxu1 %v3009_v57  ;;  %621 = vmatprep.subr.mxu0 %v2945_v40 }
  0x57   :  { %2394 = vmatprep.subr.mxu1 %v3738_v0  ;;  %622 = vmatpush1.msra.mxu0 %v2948_v41 }
  0x58   :  { %2395 = vmatpush3.msra.mxu1 %v3015_v58  ;;  %623 = vmatprep.subr.mxu0 %v2951_v42 }
  0x59   :  { %2396 = vmatprep.subr.mxu1 %v3738_v0  ;;  %624 = vmatpush1.msra.mxu0 %v2956_v43 }
  0x5a   :  { %2397 = vmatpush3.msra.mxu1 %v3022_v60  ;;  %625 = vmatprep.subr.mxu0 %v2963_v45 }
  0x5b   :  { %2398 = vmatprep.subr.mxu1 %v3738_v0  ;;  %626 = vmatpush1.msra.mxu0 %v2966_v46 }
  0x5c   :  { %2399 = vmatpush3.msra.mxu1 %v3028_v61  ;;  %627 = vmatprep.subr.mxu0 %v2970_v47 }
  0x5d   :  { %2400 = vmatprep.subr.mxu1 %v3738_v0  ;;  %628 = vmatpush1.msra.mxu0 %v2978_v49 }
  0x5e   :  { %2401 = vmatpush3.msra.mxu1 %v3038_v63  ;;  %629 = vmatprep.subr.mxu0 %v2985_v51 }
  0x5f   :  { %2402 = vmatprep.subr.mxu1 %v3738_v0  ;;  %630 = vmatpush1.msra.mxu0 %v2993_v53 }
  0x60   :  { %2403 = vmatpush3.msra.mxu1 %v3043_v2  ;;  %631 = vmatprep.subr.mxu0 %v2997_v54 }
  0x61   :  { %2404 = vmatprep.subr.mxu1 %v3738_v0  ;;  %632 = vmatpush1.msra.mxu0 %v3004_v56 }
  0x62   :  { %2405 = vmatpush3.msra.mxu1 %v3052_v4  ;;  %665 = vmatprep.mubr.f32.mxu0 %v3738_v0 }
  0x63   :  { %2406 = vmatprep.subr.mxu1 %v3738_v0  ;;  %2420 = vmatprep.mubr.msk.f32.mxu1 %vm2773_vm5, %v3738_v0 }
  0x64   :  { %2407 = vmatpush3.msra.mxu1 %v3057_v5  ;;  %826 = vmatprep.subr.mxu0 %v2836_v11 }
  0x65   :  { %2408 = vmatprep.subr.mxu1 %v3738_v0 }
  0x66   :  { %2409 = vmatpush3.msra.mxu1 %v3065_v7 }
  0x67   :  { %2410 = vmatprep.subr.mxu1 %v3738_v0 }
  0x68   :  { %2411 = vmatpush3.msra.mxu1 %v3070_v8 }
  0x69   :  { %2412 = vmatprep.subr.mxu1 %v3738_v0 }
  0x6a   :  { %2413 = vmatpush3.msra.mxu1 %v3076_v9 }
  0x6b   :  { %2414 = vmatprep.subr.mxu1 %v3738_v0 }
  0x6c   :  { %2415 = vmatpush3.msra.mxu1 %v3082_v10 }
  0x6d   :  { %2416 = vmatprep.subr.mxu1 %v3738_v0 }
  0x6e   :  { %2417 = vmatpush3.msra.mxu1 %v3088_v15 }
  0x6f   :  { %2418 = vmatprep.subr.mxu1 %v3738_v0 }
  0x70   :  { %2419 = vmatpush3.msra.mxu1 %v3094_v20 }
  0x71   :  { %2423 = vmatprep.subr.mxu1 %v3738_v0 }
  0xd8   :  { %v148_v11 = vpop.f32.mrf.mxu0 }
  0xda   :  { %v150_v21 = vpop.f32.mrf.mxu0 }
  0xdc   :  { %v3158_v25 = vpop.f32.mrf.mxu0 }
  0xdd   :  { %3750 = vst [vmem:[#allocation11_spill] sm:$0xff] %v3158_v25 }
  0xde   :  { %v3160_v27 = vpop.f32.mrf.mxu0 }
  0xdf   :  { %3751 = vst [vmem:[#allocation12_spill] sm:$0xff] %v3160_v27 }
  0xe0   :  { %v3162_v31 = vpop.f32.mrf.mxu0 }
  0xe1   :  { %3752 = vst [vmem:[#allocation13_spill] sm:$0xff] %v3162_v31 }
  0xe2   :  { %v3164_v33 = vpop.f32.mrf.mxu0 }
  0xe3   :  { %3753 = vst [vmem:[#allocation14_spill] sm:$0xff] %v3164_v33 }
  0xe4   :  { %v3166_v37 = vpop.f32.mrf.mxu0 }
  0xe5   :  { %3754 = vst [vmem:[#allocation15_spill] sm:$0xff] %v3166_v37 }
  0xe6   :  { %v3168_v39 = vpop.f32.mrf.mxu0  ;;  %v3184_v0 = vpop.f32.mrf.mxu1 }
  0xe7   :  { %3755 = vst [vmem:[#allocation16_spill] sm:$0xff] %v3168_v39  ;;  %3763 = vst [vmem:[#allocation24_spill] sm:$0xff] %v3184_v0 }
  0xe8   :  { %v3170_v44 = vpop.f32.mrf.mxu0  ;;  %v261_v31 = vpop.f32.mrf.mxu1 }
  0xe9   :  { %3756 = vst [vmem:[#allocation17_spill] sm:$0xff] %v3170_v44 }
  0xea   :  { %v3172_v50 = vpop.f32.mrf.mxu0 }
  0xeb   :  { %3757 = vst [vmem:[#allocation18_spill] sm:$0xff] %v3172_v50 }
  0xec   :  { %v3174_v59 = vpop.f32.mrf.mxu0 }
  0xed   :  { %3758 = vst [vmem:[#allocation19_spill] sm:$0xff] %v3174_v59 }
  0xee   :  { %v3176_v62 = vpop.f32.mrf.mxu0 }
  0xef   :  { %3759 = vst [vmem:[#allocation20_spill] sm:$0xff] %v3176_v62 }
  0xf0   :  { %v3178_v3 = vpop.f32.mrf.mxu0 }
  0xf1   :  { %3760 = vst [vmem:[#allocation21_spill] sm:$0xff] %v3178_v3 }
  0xf2   :  { %v3180_v6 = vpop.f32.mrf.mxu0 }
  0xf3   :  { %3761 = vst [vmem:[#allocation22_spill] sm:$0xff] %v3180_v6 }
  0xf4   :  { %v3182_v1 = vpop.f32.mrf.mxu0 }
  0xf5   :  { %3762 = vst [vmem:[#allocation23_spill] sm:$0xff] %v3182_v1 }
  0xf6   :  { %v3186_v33 = vpop.f32.mrf.mxu0 }
  0xf7   :  { %3764 = vst [vmem:[#allocation25_spill] sm:$0xff] %v3186_v33 }
  0xf8   :  { %v444_v37 = vpop.f32.mrf.mxu0 }
  0xf9   :  { %v519_v39 = vadd.f32 %v444_v37, %v148_v11  ;;  %v3188_v27 = vpop.f32.mrf.mxu1 }
  0xfa   :  { %3765 = vst [vmem:[#allocation26_spill] sm:$0xff] %v3188_v27  ;;  %v446_v50 = vpop.f32.mrf.mxu0 }
  0xfb   :  { %v2159_v44 = vmul.f32 -1.442695, %v519_v39  ;;  %v526_v59 = vadd.f32 %v446_v50, %v150_v21  ;;  %v3190_v62 = vpop.f32.mrf.mxu1 }
  0xfc   :  { %3766 = vst [vmem:[#allocation27_spill] sm:$0xff] %v3190_v62 }
  0xfd   :  { %2644 = vpow2.f32 %v2159_v44  ;;  %v2160_v3 = vmul.f32 -1.442695, %v526_v59  ;;  %v3192_v25 = vpop.f32.mrf.mxu1 }
  0xfe   :  { %3767 = vst [vmem:[#allocation28_spill] sm:$0xff] %v3192_v25 }
  0xff   :  { %2646 = vpow2.f32 %v2160_v3  ;;  %v3194_v1 = vpop.f32.mrf.mxu1 }
 0x100   :  { %3768 = vst [vmem:[#allocation29_spill] sm:$0xff] %v3194_v1  ;;  %v545_v1 = vpop.permute.xlu0 %544 }
 0x101   :  { %v3196_v33 = vpop.f32.mrf.mxu1  ;;  %vm546_vm6 = vcmp.eq.s32.totalorder %v545_v1, 1  ;;  %v3772_v1 = vld [vmem:[#allocation10_spill] sm:$0xff] }
 0x102   :  { %3769 = vst [vmem:[#allocation30_spill] sm:$0xff] %v3196_v33  ;;  %vm2167_vm7 = vcmp.gt.s32.totalorder %v3772_v1, 2  ;;  %vm2170_vm8 = vcmp.gt.s32.totalorder %v3772_v1, 3  ;;  %vm2176_vm9 = vcmp.gt.s32.totalorder %v3772_v1, 5  ;;  %vm2182_vm10 = vcmp.gt.s32.totalorder %v3772_v1, 7  ;;  %v3408_v1 = vld [vmem:[#allocation4 + $0x18] sm:$0xff] }
 0x103   :  { %v3198_v11 = vpop.f32.mrf.mxu1 }
 0x104   :  { %3770 = vst [vmem:[#allocation31_spill] sm:$0xff] %v3198_v11 }
 0x10a   :  { %v2645_v6 = vpop.eup %2644 }
 0x10b   :  { %v523_v0 = vadd.f32 1.0, %v2645_v6 }
 0x10c   :  { %v2647_v39 = vpop.eup %2646 }
 0x10d   :  { %2648 = vrcp.f32 %v523_v0  ;;  %v530_v44 = vadd.f32 1.0, %v2647_v39  ;;  %v3384_v39 = vld [vmem:[#allocation4 + $0x78] sm:$0xff] }
 0x10f   :  { %2650 = vrcp.f32 %v530_v44  ;;  %v3387_v44 = vld [vmem:[#allocation4 + $0x68] sm:$0xff] }
 0x111   :  { %v515_v37 = vpop.f32.mrf.mxu1 }
 0x113   :  { %v2387_v27 = vpop.f32.mrf.mxu1 }
 0x114   :  { %v3771_v27 = vmov 0.0  }
 0x11a   :  { %v2649_v21 = vpop.eup %2648 }
 0x11b   :  { %v533_v50 = vmul.f32 %v2649_v21, %v515_v37  ;;  %v3381_v37 = vld [vmem:[#allocation4 + $0x80] sm:$0xff] }
 0x11c   :  { %v2651_v25 = vpop.eup %2650  ;;  %v3390_v21 = vld [vmem:[#allocation4 + $0x60] sm:$0xff] }
 0x11d   :  { %v534_v59 = vadd.f32 %v533_v50, %v261_v31  ;;  %v536_v3 = vsub.f32 1.0, %v2651_v25  ;;  %v538_v6 = vmul.f32 0.0, %v2651_v25  ;;  %v3367_v25 = vld [vmem:[#allocation4 + $0xb0] sm:$0xff]  ;;  %v3370_v31 = vld [vmem:[#allocation4 + $0xa8] sm:$0xff] }
 0x11e   :  { %v3393_v50 = vld [vmem:[#allocation4 + $0x50] sm:$0xff] }
 0x11f   :  { %2652 = vtanh.f32 %v534_v59  ;;  %v3396_v59 = vld [vmem:[#allocation4 + $0x48] sm:$0xff] }
 0x12c   :  { %v2653_v62 = vpop.eup %2652 }
 0x12d   :  { %v537_v52 = vmul.f32 %v2653_v62, %v536_v3  ;;  %v3378_v62 = vld [vmem:[#allocation4 + $0x90] sm:$0xff]  ;;  %v3399_v3 = vld [vmem:[#allocation4 + $0x38] sm:$0xff] }
 0x12f   :  { %v539_v33 = vadd.f32 %v538_v6, %v537_v52  ;;  %v769_v52 = vpop.permute.xlu0 %768  ;;  %v3402_v6 = vld [vmem:[#allocation4 + $0x30] sm:$0xff] }
 0x130   :  { %vm770_vm11 = vcmp.eq.s32.totalorder %v769_v52, 1 }
 0x131   :  { %v3200_v0 = vsel %vm546_vm6, %v539_v33, 0.0  ;;  %2183 = vmatmul.mubr.msk.f32.vlgmr.msra.gmra.mxu0 %vm546_vm6, %v539_v33  ;;  %2421 = vmatmul.mubr.msk.f32.vlgmr.msra.gmra.mxu1 %vm546_vm6, %v539_v33  ;;  %v3375_v33 = vld [vmem:[#allocation4 + $0x98] sm:$0xff] }
 0x132   :  { %548 = vst [vmem:[#allocation7] sm:$0xff] %v3200_v0  ;;  %827 = vmatpush1.msra.mxu0 %v2838_v12  ;;  %2424 = vmatpush3.msra.mxu1 %v2974_v48  ;;  %v3773_v12 = vmov 0  }
 0x133   :  { %828 = vmatprep.subr.mxu0 %v2840_v13  ;;  %2425 = vmatprep.subr.mxu1 %v3771_v27  ;;  %v991_v13 = vsel %vm2167_vm7, 1, %v3773_v12 }
 0x134   :  { %829 = vmatpush1.msra.mxu0 %v2844_v14  ;;  %2426 = vmatpush3.msra.mxu1 %v3000_v55  ;;  %v1216_v14 = vsel %vm2170_vm8, 1, %v3773_v12 }
 0x135   :  { %830 = vmatprep.subr.mxu0 %v2853_v16  ;;  %2427 = vmatprep.subr.mxu1 %v3771_v27  ;;  %v1666_v16 = vsel %vm2176_vm9, 1, %v3773_v12 }
 0x136   :  { %831 = vmatpush1.msra.mxu0 %v2856_v17  ;;  %2428 = vmatpush3.msra.mxu1 %v3009_v57  ;;  %v2116_v17 = vsel %vm2182_vm10, 1, %v3773_v12  ;;  %v3411_v12 = vld [vmem:[#allocation4 + $0x8] sm:$0xff] }
 0x137   :  { %832 = vmatprep.subr.mxu0 %v2859_v18  ;;  %2429 = vmatprep.subr.mxu1 %v3771_v27 }
 0x138   :  { %833 = vmatpush1.msra.mxu0 %v2864_v19  ;;  %2430 = vmatpush3.msra.mxu1 %v3015_v58 }
 0x139   :  { %834 = vmatprep.subr.mxu0 %v2876_v22  ;;  %2431 = vmatprep.subr.mxu1 %v3771_v27  ;;  %v3774_v22 = vld [vmem:[#allocation11_spill] sm:$0xff] }
 0x13a   :  { %835 = vmatpush1.msra.mxu0 %v2879_v23  ;;  %2432 = vmatpush3.msra.mxu1 %v3022_v60  ;;  %3778 = vst [vmem:[#allocation11_spill] sm:$0xff] %v3411_v12 }
 0x13b   :  { %836 = vmatprep.subr.mxu0 %v2882_v24  ;;  %2433 = vmatprep.subr.mxu1 %v3771_v27 }
 0x13c   :  { %837 = vmatpush1.msra.mxu0 %v2890_v26  ;;  %2434 = vmatpush3.msra.mxu1 %v3028_v61 }
 0x13d   :  { %838 = vmatprep.subr.mxu0 %v2899_v28  ;;  %2435 = vmatprep.subr.mxu1 %v3771_v27 }
 0x13e   :  { %839 = vmatpush1.msra.mxu0 %v2902_v29  ;;  %2436 = vmatpush3.msra.mxu1 %v3038_v63  ;;  %v3775_v29 = vld [vmem:[#allocation12_spill] sm:$0xff] }
 0x13f   :  { %840 = vmatprep.subr.mxu0 %v2905_v30  ;;  %2437 = vmatprep.subr.mxu1 %v3771_v27 }
 0x140   :  { %841 = vmatpush1.msra.mxu0 %v2913_v32  ;;  %2438 = vmatpush3.msra.mxu1 %v3043_v2 }
 0x141   :  { %842 = vmatprep.subr.mxu0 %v2922_v34  ;;  %2439 = vmatprep.subr.mxu1 %v3771_v27 }
 0x142   :  { %843 = vmatpush1.msra.mxu0 %v2925_v35  ;;  %2440 = vmatpush3.msra.mxu1 %v3052_v4 }
 0x143   :  { %844 = vmatprep.subr.mxu0 %v2928_v36  ;;  %2441 = vmatprep.subr.mxu1 %v3771_v27 }
 0x144   :  { %845 = vmatpush1.msra.mxu0 %v2936_v38  ;;  %2442 = vmatpush3.msra.mxu1 %v3057_v5 }
 0x145   :  { %846 = vmatprep.subr.mxu0 %v2945_v40  ;;  %2443 = vmatprep.subr.mxu1 %v3771_v27 }
 0x146   :  { %847 = vmatpush1.msra.mxu0 %v2948_v41  ;;  %2444 = vmatpush3.msra.mxu1 %v3065_v7 }
 0x147   :  { %848 = vmatprep.subr.mxu0 %v2951_v42  ;;  %2445 = vmatprep.subr.mxu1 %v3771_v27  ;;  %v3776_v42 = vld [vmem:[#allocation24_spill] sm:$0xff] }
 0x148   :  { %849 = vmatpush1.msra.mxu0 %v2956_v43  ;;  %2446 = vmatpush3.msra.mxu1 %v3070_v8 }
 0x149   :  { %850 = vmatprep.subr.mxu0 %v2963_v45  ;;  %2447 = vmatprep.subr.mxu1 %v3771_v27 }
 0x14a   :  { %851 = vmatpush1.msra.mxu0 %v2966_v46  ;;  %2448 = vmatpush3.msra.mxu1 %v3076_v9 }
 0x14b   :  { %852 = vmatprep.subr.mxu0 %v2970_v47  ;;  %2449 = vmatprep.subr.mxu1 %v3771_v27 }
 0x14c   :  { %853 = vmatpush1.msra.mxu0 %v2978_v49  ;;  %2450 = vmatpush3.msra.mxu1 %v3082_v10 }
 0x14d   :  { %854 = vmatprep.subr.mxu0 %v2985_v51  ;;  %2451 = vmatprep.subr.mxu1 %v3771_v27 }
 0x14e   :  { %855 = vmatpush1.msra.mxu0 %v2993_v53  ;;  %2452 = vmatpush3.msra.mxu1 %v3088_v15 }
 0x14f   :  { %856 = vmatprep.subr.mxu0 %v2997_v54  ;;  %2453 = vmatprep.subr.mxu1 %v3771_v27 }
 0x150   :  { %857 = vmatpush1.msra.mxu0 %v3004_v56  ;;  %890 = vmatprep.mubr.f32.mxu0 %v3771_v27 }
 0x151   :  { %2454 = vmatpush3.msra.mxu1 %v3094_v20  ;;  %2455 = vmatprep.mubr.msk.f32.mxu1 %vm2773_vm5, %v3771_v27 }
 0x152   :  { %2458 = vmatprep.subr.mxu1 %v3771_v27  ;;  %993 = vperm.xlu1 %2643, %v991_v13   ;;  %v3414_v13 = vld [vmem:[#allocation4] sm:$0xff] }
 0x153   :  { %3779 = vst [vmem:[#allocation12_spill] sm:$0xff] %v3414_v13 }
 0x156   :  { %1218 = vperm.xlu1 %2643, %v1216_v14  }
 0x15a   :  { %1668 = vperm.xlu1 %2643, %v1666_v16  }
 0x15e   :  { %2118 = vperm.xlu1 %2643, %v2116_v17   ;;  %v3780_v17 = vld [vmem:[#allocation13_spill] sm:$0xff] }
 0x1f1   :  { %v667_v18 = vpop.f32.mrf.mxu0  ;;  %v738_v19 = vpop.f32.mrf.mxu1 }
 0x1f2   :  { %v742_v23 = vadd.f32 %v667_v18, %v3774_v22 }
 0x1f3   :  { %v2422_v24 = vpop.f32.mrf.mxu1  ;;  %v669_v28 = vpop.f32.mrf.mxu0 }
 0x1f4   :  { %v2162_v26 = vmul.f32 -1.442695, %v742_v23  ;;  %v749_v30 = vadd.f32 %v669_v28, %v3775_v29  ;;  %v3781_v24 = vld [vmem:[#allocation14_spill] sm:$0xff] }
 0x1f6   :  { %2654 = vpow2.f32 %v2162_v26  ;;  %v2163_v32 = vmul.f32 -1.442695, %v749_v30 }
 0x1f8   :  { %2656 = vpow2.f32 %v2163_v32 }
 0x203   :  { %v2655_v34 = vpop.eup %2654 }
 0x204   :  { %v746_v35 = vadd.f32 1.0, %v2655_v34 }
 0x205   :  { %v2657_v36 = vpop.eup %2656 }
 0x206   :  { %2658 = vrcp.f32 %v746_v35  ;;  %v753_v38 = vadd.f32 1.0, %v2657_v36 }
 0x208   :  { %2660 = vrcp.f32 %v753_v38  ;;  %v3782_v38 = vld [vmem:[#allocation27_spill] sm:$0xff] }
 0x213   :  { %v2659_v40 = vpop.eup %2658 }
 0x214   :  { %v756_v41 = vmul.f32 %v2659_v40, %v738_v19 }
 0x215   :  { %v2661_v45 = vpop.eup %2660 }
 0x216   :  { %v757_v43 = vadd.f32 %v3776_v42, %v756_v41  ;;  %v759_v46 = vsub.f32 1.0, %v2661_v45  ;;  %v761_v51 = vmul.f32 %v2661_v45, %v3200_v0  ;;  %v994_v45 = vpop.permute.xlu1 %993 }
 0x217   :  { %vm995_vm12 = vcmp.eq.s32.totalorder %v994_v45, 1 }
 0x218   :  { %2662 = vtanh.f32 %v757_v43 }
 0x225   :  { %v2663_v47 = vpop.eup %2662 }
 0x226   :  { %v760_v49 = vmul.f32 %v2663_v47, %v759_v46 }
 0x228   :  { %v762_v53 = vadd.f32 %v761_v51, %v760_v49 }
 0x22a   :  { %v771_v54 = vsel %vm770_vm11, %v762_v53, 0.0  ;;  %v3282_v56 = vsel %vm770_vm11, %v762_v53, %v3200_v0  ;;  %v3405_v0 = vld [vmem:[#allocation4 + $0x20] sm:$0xff]  ;;  %v3462_v53 = vld [vmem:[#allocation4 + $0x178] sm:$0xff] }
 0x22b   :  { %773 = vst [vmem:[#allocation7 + $0x8] sm:$0xff] %v771_v54  ;;  %891 = vmatmul.mubr.f32.vlgmr.msra.gmra.mxu0 %v3282_v56  ;;  %2456 = vmatmul.mubr.f32.vlgmr.msra.gmra.mxu1 %v3282_v56  ;;  %v3466_v54 = vld [vmem:[#allocation4 + $0x160] sm:$0xff] }
 0x22c   :  { %2459 = vmatpush3.msra.mxu1 %v2974_v48  ;;  %1115 = vmatprep.mubr.f32.mxu0 %v3771_v27  ;;  %v3321_v48 = vld [vmem:[#allocation4 + $0x170] sm:$0xff] }
 0x22d   :  { %2460 = vmatprep.subr.mxu1 %v3771_v27  ;;  %2490 = vmatprep.mubr.msk.f32.mxu1 %vm2773_vm5, %v3771_v27  ;;  %3777 = vst [vmem:[#allocation10_spill] sm:$0xff] %v3321_v48 }
 0x22e   :  { %2461 = vmatpush3.msra.mxu1 %v3000_v55  ;;  %1051 = vmatprep.subr.mxu0 %v3321_v48  ;;  %v3324_v55 = vld [vmem:[#allocation4 + $0x168] sm:$0xff] }
 0x22f   :  { %2462 = vmatprep.subr.mxu1 %v3771_v27  ;;  %1052 = vmatpush1.msra.mxu0 %v3324_v55 }
 0x230   :  { %2463 = vmatpush3.msra.mxu1 %v3009_v57  ;;  %v3327_v57 = vld [vmem:[#allocation4 + $0x158] sm:$0xff] }
 0x231   :  { %2464 = vmatprep.subr.mxu1 %v3771_v27  ;;  %1053 = vmatprep.subr.mxu0 %v3327_v57 }
 0x232   :  { %2465 = vmatpush3.msra.mxu1 %v3015_v58  ;;  %v3330_v58 = vld [vmem:[#allocation4 + $0x150] sm:$0xff] }
 0x233   :  { %2466 = vmatprep.subr.mxu1 %v3771_v27  ;;  %1054 = vmatpush1.msra.mxu0 %v3330_v58 }
 0x234   :  { %2467 = vmatpush3.msra.mxu1 %v3022_v60  ;;  %v3333_v60 = vld [vmem:[#allocation4 + $0x140] sm:$0xff] }
 0x235   :  { %2468 = vmatprep.subr.mxu1 %v3771_v27  ;;  %1055 = vmatprep.subr.mxu0 %v3333_v60 }
 0x236   :  { %2469 = vmatpush3.msra.mxu1 %v3028_v61  ;;  %v3336_v61 = vld [vmem:[#allocation4 + $0x138] sm:$0xff] }
 0x237   :  { %2470 = vmatprep.subr.mxu1 %v3771_v27  ;;  %1056 = vmatpush1.msra.mxu0 %v3336_v61 }
 0x238   :  { %2471 = vmatpush3.msra.mxu1 %v3038_v63  ;;  %v3339_v63 = vld [vmem:[#allocation4 + $0x128] sm:$0xff] }
 0x239   :  { %2472 = vmatprep.subr.mxu1 %v3771_v27  ;;  %1057 = vmatprep.subr.mxu0 %v3339_v63 }
 0x23a   :  { %2473 = vmatpush3.msra.mxu1 %v3043_v2  ;;  %v3342_v2 = vld [vmem:[#allocation4 + $0x120] sm:$0xff] }
 0x23b   :  { %2474 = vmatprep.subr.mxu1 %v3771_v27  ;;  %1058 = vmatpush1.msra.mxu0 %v3342_v2 }
 0x23c   :  { %2475 = vmatpush3.msra.mxu1 %v3052_v4  ;;  %v3345_v4 = vld [vmem:[#allocation4 + $0x110] sm:$0xff] }
 0x23d   :  { %2476 = vmatprep.subr.mxu1 %v3771_v27  ;;  %1059 = vmatprep.subr.mxu0 %v3345_v4 }
 0x23e   :  { %2477 = vmatpush3.msra.mxu1 %v3057_v5  ;;  %v3348_v5 = vld [vmem:[#allocation4 + $0x108] sm:$0xff] }
 0x23f   :  { %2478 = vmatprep.subr.mxu1 %v3771_v27  ;;  %1060 = vmatpush1.msra.mxu0 %v3348_v5 }
 0x240   :  { %2479 = vmatpush3.msra.mxu1 %v3065_v7  ;;  %v3351_v7 = vld [vmem:[#allocation4 + $0xf8] sm:$0xff] }
 0x241   :  { %2480 = vmatprep.subr.mxu1 %v3771_v27  ;;  %1061 = vmatprep.subr.mxu0 %v3351_v7 }
 0x242   :  { %2481 = vmatpush3.msra.mxu1 %v3070_v8  ;;  %v3354_v8 = vld [vmem:[#allocation4 + $0xf0] sm:$0xff] }
 0x243   :  { %2482 = vmatprep.subr.mxu1 %v3771_v27  ;;  %1062 = vmatpush1.msra.mxu0 %v3354_v8 }
 0x244   :  { %2483 = vmatpush3.msra.mxu1 %v3076_v9  ;;  %v3357_v9 = vld [vmem:[#allocation4 + $0xe0] sm:$0xff] }
 0x245   :  { %2484 = vmatprep.subr.mxu1 %v3771_v27  ;;  %1063 = vmatprep.subr.mxu0 %v3357_v9 }
 0x246   :  { %2485 = vmatpush3.msra.mxu1 %v3082_v10  ;;  %v3360_v10 = vld [vmem:[#allocation4 + $0xd8] sm:$0xff] }
 0x247   :  { %2486 = vmatprep.subr.mxu1 %v3771_v27  ;;  %1064 = vmatpush1.msra.mxu0 %v3360_v10 }
 0x248   :  { %2487 = vmatpush3.msra.mxu1 %v3088_v15  ;;  %v3363_v15 = vld [vmem:[#allocation4 + $0xc8] sm:$0xff] }
 0x249   :  { %2488 = vmatprep.subr.mxu1 %v3771_v27  ;;  %1065 = vmatprep.subr.mxu0 %v3363_v15 }
 0x24a   :  { %2489 = vmatpush3.msra.mxu1 %v3094_v20  ;;  %v3365_v20 = vld [vmem:[#allocation4 + $0xc0] sm:$0xff] }
 0x24b   :  { %2493 = vmatprep.subr.mxu1 %v3771_v27  ;;  %1066 = vmatpush1.msra.mxu0 %v3365_v20 }
 0x24c   :  { %1067 = vmatprep.subr.mxu0 %v3367_v25 }
 0x24d   :  { %1068 = vmatpush1.msra.mxu0 %v3370_v31 }
 0x24e   :  { %1069 = vmatprep.subr.mxu0 %v3375_v33 }
 0x24f   :  { %1070 = vmatpush1.msra.mxu0 %v3378_v62 }
 0x250   :  { %1071 = vmatprep.subr.mxu0 %v3381_v37 }
 0x251   :  { %1072 = vmatpush1.msra.mxu0 %v3384_v39 }
 0x252   :  { %1073 = vmatprep.subr.mxu0 %v3387_v44 }
 0x253   :  { %1074 = vmatpush1.msra.mxu0 %v3390_v21 }
 0x254   :  { %1075 = vmatprep.subr.mxu0 %v3393_v50 }
 0x255   :  { %1076 = vmatpush1.msra.mxu0 %v3396_v59 }
 0x256   :  { %1077 = vmatprep.subr.mxu0 %v3399_v3 }
 0x257   :  { %1078 = vmatpush1.msra.mxu0 %v3402_v6 }
 0x258   :  { %1079 = vmatprep.subr.mxu0 %v3405_v0 }
 0x259   :  { %1080 = vmatpush1.msra.mxu0 %v3408_v1 }
 0x25a   :  { %1081 = vmatprep.subr.mxu0 %v3411_v12 }
 0x25b   :  { %1082 = vmatpush1.msra.mxu0 %v3414_v13 }
 0x25c   :  { %1276 = vmatprep.subr.mxu0 %v3321_v48 }
 0x2eb   :  { %v892_v14 = vpop.f32.mrf.mxu0  ;;  %v963_v16 = vpop.f32.mrf.mxu1 }
 0x2ec   :  { %v967_v18 = vadd.f32 %v892_v14, %v3780_v17  ;;  %v3474_v14 = vld [vmem:[#allocation4 + $0x130] sm:$0xff]  ;;  %v3482_v17 = vld [vmem:[#allocation4 + $0x100] sm:$0xff] }
 0x2ed   :  { %v2457_v19 = vpop.f32.mrf.mxu1  ;;  %v894_v23 = vpop.f32.mrf.mxu0 }
 0x2ee   :  { %v2165_v22 = vmul.f32 -1.442695, %v967_v18  ;;  %v974_v26 = vadd.f32 %v894_v23, %v3781_v24  ;;  %v3486_v18 = vld [vmem:[#allocation4 + $0xe8] sm:$0xff]  ;;  %v3489_v19 = vld [vmem:[#allocation4 + $0xd0] sm:$0xff]  ;;  %v3496_v23 = vld [vmem:[#allocation4 + $0xa0] sm:$0xff] }
 0x2ef   :  { %v3500_v24 = vld [vmem:[#allocation4 + $0x88] sm:$0xff] }
 0x2f0   :  { %2664 = vpow2.f32 %v2165_v22  ;;  %v2166_v28 = vmul.f32 -1.442695, %v974_v26  ;;  %v3492_v22 = vld [vmem:[#allocation4 + $0xb8] sm:$0xff]  ;;  %v3504_v26 = vld [vmem:[#allocation4 + $0x70] sm:$0xff] }
 0x2f2   :  { %2666 = vpow2.f32 %v2166_v28  ;;  %v3508_v28 = vld [vmem:[#allocation4 + $0x58] sm:$0xff] }
 0x2fd   :  { %v2665_v29 = vpop.eup %2664 }
 0x2fe   :  { %v971_v30 = vadd.f32 1.0, %v2665_v29  ;;  %v3512_v29 = vld [vmem:[#allocation4 + $0x40] sm:$0xff] }
 0x2ff   :  { %v2667_v32 = vpop.eup %2666 }
 0x300   :  { %2668 = vrcp.f32 %v971_v30  ;;  %v978_v34 = vadd.f32 1.0, %v2667_v32  ;;  %v3516_v30 = vld [vmem:[#allocation4 + $0x28] sm:$0xff]  ;;  %v3520_v32 = vld [vmem:[#allocation4 + $0x10] sm:$0xff] }
 0x301   :  { %3783 = vst [vmem:[#allocation24_spill] sm:$0xff] %v3520_v32 }
 0x302   :  { %2670 = vrcp.f32 %v978_v34 }
 0x30d   :  { %v2669_v35 = vpop.eup %2668 }
 0x30e   :  { %v981_v36 = vmul.f32 %v2669_v35, %v963_v16  ;;  %v3478_v16 = vld [vmem:[#allocation4 + $0x118] sm:$0xff] }
 0x30f   :  { %v2671_v41 = vpop.eup %2670 }
 0x310   :  { %v982_v40 = vadd.f32 %v981_v36, %v3782_v38  ;;  %v984_v42 = vsub.f32 1.0, %v2671_v41  ;;  %v986_v47 = vmul.f32 %v2671_v41, %v3282_v56  ;;  %v3784_v36 = vld [vmem:[#allocation15_spill] sm:$0xff] }
 0x312   :  { %2672 = vtanh.f32 %v982_v40 }
 0x31f   :  { %v2673_v43 = vpop.eup %2672 }
 0x320   :  { %v985_v46 = vmul.f32 %v2673_v43, %v984_v42  ;;  %v3785_v43 = vld [vmem:[#allocation16_spill] sm:$0xff] }
 0x322   :  { %v987_v49 = vadd.f32 %v986_v47, %v985_v46 }
 0x324   :  { %v996_v51 = vsel %vm995_vm12, %v987_v49, 0.0  ;;  %v3423_v52 = vsel %vm995_vm12, %v987_v49, %v3282_v56  ;;  %v3470_v56 = vld [vmem:[#allocation4 + $0x148] sm:$0xff] }
 0x325   :  { %998 = vst [vmem:[#allocation7 + $0x10] sm:$0xff] %v996_v51  ;;  %1116 = vmatmul.mubr.f32.vlgmr.msra.gmra.mxu0 %v3423_v52  ;;  %2491 = vmatmul.mubr.f32.vlgmr.msra.gmra.mxu1 %v3423_v52 }
 0x326   :  { %1277 = vmatpush1.msra.mxu0 %v3324_v55  ;;  %1340 = vmatprep.mubr.f32.mxu0 %v3771_v27 }
 0x327   :  { %1278 = vmatprep.subr.mxu0 %v3327_v57  ;;  %2525 = vmatprep.mubr.msk.f32.mxu1 %vm2773_vm5, %v3771_v27 }
 0x328   :  { %1279 = vmatpush1.msra.mxu0 %v3330_v58  ;;  %2494 = vmatpush3.msra.mxu1 %v3462_v53 }
 0x329   :  { %1280 = vmatprep.subr.mxu0 %v3333_v60  ;;  %2495 = vmatprep.subr.mxu1 %v3771_v27 }
 0x32a   :  { %1281 = vmatpush1.msra.mxu0 %v3336_v61  ;;  %2496 = vmatpush3.msra.mxu1 %v3466_v54 }
 0x32b   :  { %1282 = vmatprep.subr.mxu0 %v3339_v63  ;;  %2497 = vmatprep.subr.mxu1 %v3771_v27 }
 0x32c   :  { %1283 = vmatpush1.msra.mxu0 %v3342_v2  ;;  %2498 = vmatpush3.msra.mxu1 %v3470_v56 }
 0x32d   :  { %1284 = vmatprep.subr.mxu0 %v3345_v4  ;;  %2499 = vmatprep.subr.mxu1 %v3771_v27 }
 0x32e   :  { %1285 = vmatpush1.msra.mxu0 %v3348_v5  ;;  %2500 = vmatpush3.msra.mxu1 %v3474_v14 }
 0x32f   :  { %1286 = vmatprep.subr.mxu0 %v3351_v7  ;;  %2501 = vmatprep.subr.mxu1 %v3771_v27 }
 0x330   :  { %1287 = vmatpush1.msra.mxu0 %v3354_v8  ;;  %2502 = vmatpush3.msra.mxu1 %v3478_v16 }
 0x331   :  { %1288 = vmatprep.subr.mxu0 %v3357_v9  ;;  %2503 = vmatprep.subr.mxu1 %v3771_v27 }
 0x332   :  { %1289 = vmatpush1.msra.mxu0 %v3360_v10  ;;  %2504 = vmatpush3.msra.mxu1 %v3482_v17 }
 0x333   :  { %1290 = vmatprep.subr.mxu0 %v3363_v15  ;;  %2505 = vmatprep.subr.mxu1 %v3771_v27 }
 0x334   :  { %1291 = vmatpush1.msra.mxu0 %v3365_v20  ;;  %2506 = vmatpush3.msra.mxu1 %v3486_v18 }
 0x335   :  { %1292 = vmatprep.subr.mxu0 %v3367_v25  ;;  %2507 = vmatprep.subr.mxu1 %v3771_v27 }
 0x336   :  { %1293 = vmatpush1.msra.mxu0 %v3370_v31  ;;  %2508 = vmatpush3.msra.mxu1 %v3489_v19 }
 0x337   :  { %1294 = vmatprep.subr.mxu0 %v3375_v33  ;;  %2509 = vmatprep.subr.mxu1 %v3771_v27 }
 0x338   :  { %1295 = vmatpush1.msra.mxu0 %v3378_v62  ;;  %2510 = vmatpush3.msra.mxu1 %v3492_v22 }
 0x339   :  { %1296 = vmatprep.subr.mxu0 %v3381_v37  ;;  %2511 = vmatprep.subr.mxu1 %v3771_v27 }
 0x33a   :  { %1297 = vmatpush1.msra.mxu0 %v3384_v39  ;;  %2512 = vmatpush3.msra.mxu1 %v3496_v23 }
 0x33b   :  { %1298 = vmatprep.subr.mxu0 %v3387_v44  ;;  %2513 = vmatprep.subr.mxu1 %v3771_v27 }
 0x33c   :  { %1299 = vmatpush1.msra.mxu0 %v3390_v21  ;;  %2514 = vmatpush3.msra.mxu1 %v3500_v24 }
 0x33d   :  { %1300 = vmatprep.subr.mxu0 %v3393_v50  ;;  %2515 = vmatprep.subr.mxu1 %v3771_v27 }
 0x33e   :  { %1301 = vmatpush1.msra.mxu0 %v3396_v59  ;;  %2516 = vmatpush3.msra.mxu1 %v3504_v26 }
 0x33f   :  { %1302 = vmatprep.subr.mxu0 %v3399_v3  ;;  %2517 = vmatprep.subr.mxu1 %v3771_v27 }
 0x340   :  { %1303 = vmatpush1.msra.mxu0 %v3402_v6  ;;  %2518 = vmatpush3.msra.mxu1 %v3508_v28 }
 0x341   :  { %1304 = vmatprep.subr.mxu0 %v3405_v0  ;;  %2519 = vmatprep.subr.mxu1 %v3771_v27 }
 0x342   :  { %1305 = vmatpush1.msra.mxu0 %v3408_v1  ;;  %2520 = vmatpush3.msra.mxu1 %v3512_v29 }
 0x343   :  { %1306 = vmatprep.subr.mxu0 %v3411_v12  ;;  %2521 = vmatprep.subr.mxu1 %v3771_v27 }
 0x344   :  { %1307 = vmatpush1.msra.mxu0 %v3414_v13  ;;  %2522 = vmatpush3.msra.mxu1 %v3516_v30  ;;  %v3786_v13 = vld [vmem:[#allocation26_spill] sm:$0xff] }
 0x345   :  { %1501 = vmatprep.subr.mxu0 %v3321_v48  ;;  %2523 = vmatprep.subr.mxu1 %v3771_v27 }
 0x346   :  { %2524 = vmatpush3.msra.mxu1 %v3520_v32 }
 0x347   :  { %2528 = vmatprep.subr.mxu1 %v3771_v27 }
 0x3e5   :  { %v1117_v34 = vpop.f32.mrf.mxu0  ;;  %v1188_v35 = vpop.f32.mrf.mxu1 }
 0x3e6   :  { %v1192_v38 = vadd.f32 %v1117_v34, %v3784_v36 }
 0x3e7   :  { %v2492_v40 = vpop.f32.mrf.mxu1  ;;  %v1119_v42 = vpop.f32.mrf.mxu0 }
 0x3e8   :  { %v2168_v41 = vmul.f32 -1.442695, %v1192_v38  ;;  %v1199_v45 = vadd.f32 %v1119_v42, %v3785_v43  ;;  %v1219_v42 = vpop.permute.xlu1 %1218 }
 0x3e9   :  { %vm1220_vm13 = vcmp.eq.s32.totalorder %v1219_v42, 1 }
 0x3ea   :  { %2674 = vpow2.f32 %v2168_v41  ;;  %v2169_v46 = vmul.f32 -1.442695, %v1199_v45 }
 0x3ec   :  { %2676 = vpow2.f32 %v2169_v46 }
 0x3f7   :  { %v2675_v47 = vpop.eup %2674 }
 0x3f8   :  { %v1196_v49 = vadd.f32 1.0, %v2675_v47 }
 0x3f9   :  { %v2677_v51 = vpop.eup %2676 }
 0x3fa   :  { %2678 = vrcp.f32 %v1196_v49  ;;  %v1203_v11 = vadd.f32 1.0, %v2677_v51 }
 0x3fc   :  { %2680 = vrcp.f32 %v1203_v11  ;;  %v3787_v11 = vld [vmem:[#allocation11_spill] sm:$0xff] }
 0x407   :  { %v2679_v48 = vpop.eup %2678 }
 0x408   :  { %v1206_v32 = vmul.f32 %v2679_v48, %v1188_v35  ;;  %v3788_v48 = vld [vmem:[#allocation12_spill] sm:$0xff]  ;;  %v3791_v35 = vld [vmem:[#allocation17_spill] sm:$0xff] }
 0x409   :  { %v2681_v34 = vpop.eup %2680 }
 0x40a   :  { %v1207_v12 = vadd.f32 %v3786_v13, %v1206_v32  ;;  %v1209_v36 = vsub.f32 1.0, %v2681_v34  ;;  %v1211_v41 = vmul.f32 %v2681_v34, %v3423_v52  ;;  %v3790_v13 = vld [vmem:[#allocation10_spill] sm:$0xff] }
 0x40c   :  { %2682 = vtanh.f32 %v1207_v12  ;;  %v3789_v12 = vld [vmem:[#allocation24_spill] sm:$0xff] }
 0x419   :  { %v2683_v38 = vpop.eup %2682 }
 0x41a   :  { %v1210_v40 = vmul.f32 %v2683_v38, %v1209_v36  ;;  %v3792_v36 = vld [vmem:[#allocation18_spill] sm:$0xff] }
 0x41c   :  { %v1212_v43 = vadd.f32 %v1211_v41, %v1210_v40 }
 0x41e   :  { %v1221_v45 = vsel %vm1220_vm13, %v1212_v43, 0.0  ;;  %v3531_v46 = vsel %vm1220_vm13, %v1212_v43, %v3423_v52 }
 0x41f   :  { %1223 = vst [vmem:[#allocation7 + $0x18] sm:$0xff] %v1221_v45  ;;  %1341 = vmatmul.mubr.f32.vlgmr.msra.gmra.mxu0 %v3531_v46  ;;  %2526 = vmatmul.mubr.f32.vlgmr.msra.gmra.mxu1 %v3531_v46 }
 0x420   :  { %1502 = vmatpush1.msra.mxu0 %v3324_v55  ;;  %2529 = vmatpush3.msra.mxu1 %v3462_v53 }
 0x421   :  { %1503 = vmatprep.subr.mxu0 %v3327_v57  ;;  %2530 = vmatprep.subr.mxu1 %v3771_v27 }
 0x422   :  { %1504 = vmatpush1.msra.mxu0 %v3330_v58  ;;  %2531 = vmatpush3.msra.mxu1 %v3466_v54 }
 0x423   :  { %1505 = vmatprep.subr.mxu0 %v3333_v60  ;;  %2532 = vmatprep.subr.mxu1 %v3771_v27 }
 0x424   :  { %1506 = vmatpush1.msra.mxu0 %v3336_v61  ;;  %2533 = vmatpush3.msra.mxu1 %v3470_v56 }
 0x425   :  { %1507 = vmatprep.subr.mxu0 %v3339_v63  ;;  %2534 = vmatprep.subr.mxu1 %v3771_v27 }
 0x426   :  { %1508 = vmatpush1.msra.mxu0 %v3342_v2  ;;  %2535 = vmatpush3.msra.mxu1 %v3474_v14 }
 0x427   :  { %1509 = vmatprep.subr.mxu0 %v3345_v4  ;;  %2536 = vmatprep.subr.mxu1 %v3771_v27 }
 0x428   :  { %1510 = vmatpush1.msra.mxu0 %v3348_v5  ;;  %2537 = vmatpush3.msra.mxu1 %v3478_v16 }
 0x429   :  { %1511 = vmatprep.subr.mxu0 %v3351_v7  ;;  %2538 = vmatprep.subr.mxu1 %v3771_v27 }
 0x42a   :  { %1512 = vmatpush1.msra.mxu0 %v3354_v8  ;;  %2539 = vmatpush3.msra.mxu1 %v3482_v17 }
 0x42b   :  { %1513 = vmatprep.subr.mxu0 %v3357_v9  ;;  %2540 = vmatprep.subr.mxu1 %v3771_v27 }
 0x42c   :  { %1514 = vmatpush1.msra.mxu0 %v3360_v10  ;;  %2541 = vmatpush3.msra.mxu1 %v3486_v18 }
 0x42d   :  { %1515 = vmatprep.subr.mxu0 %v3363_v15  ;;  %2542 = vmatprep.subr.mxu1 %v3771_v27 }
 0x42e   :  { %1516 = vmatpush1.msra.mxu0 %v3365_v20  ;;  %2543 = vmatpush3.msra.mxu1 %v3489_v19 }
 0x42f   :  { %1517 = vmatprep.subr.mxu0 %v3367_v25  ;;  %2544 = vmatprep.subr.mxu1 %v3771_v27 }
 0x430   :  { %1518 = vmatpush1.msra.mxu0 %v3370_v31  ;;  %2545 = vmatpush3.msra.mxu1 %v3492_v22 }
 0x431   :  { %1519 = vmatprep.subr.mxu0 %v3375_v33  ;;  %2546 = vmatprep.subr.mxu1 %v3771_v27 }
 0x432   :  { %1520 = vmatpush1.msra.mxu0 %v3378_v62  ;;  %2547 = vmatpush3.msra.mxu1 %v3496_v23 }
 0x433   :  { %1521 = vmatprep.subr.mxu0 %v3381_v37  ;;  %2548 = vmatprep.subr.mxu1 %v3771_v27 }
 0x434   :  { %1522 = vmatpush1.msra.mxu0 %v3384_v39  ;;  %2549 = vmatpush3.msra.mxu1 %v3500_v24 }
 0x435   :  { %1523 = vmatprep.subr.mxu0 %v3387_v44  ;;  %2550 = vmatprep.subr.mxu1 %v3771_v27 }
 0x436   :  { %1524 = vmatpush1.msra.mxu0 %v3390_v21  ;;  %2551 = vmatpush3.msra.mxu1 %v3504_v26 }
 0x437   :  { %1525 = vmatprep.subr.mxu0 %v3393_v50  ;;  %2552 = vmatprep.subr.mxu1 %v3771_v27 }
 0x438   :  { %1526 = vmatpush1.msra.mxu0 %v3396_v59  ;;  %2553 = vmatpush3.msra.mxu1 %v3508_v28 }
 0x439   :  { %1527 = vmatprep.subr.mxu0 %v3399_v3  ;;  %2554 = vmatprep.subr.mxu1 %v3771_v27 }
 0x43a   :  { %1528 = vmatpush1.msra.mxu0 %v3402_v6  ;;  %2555 = vmatpush3.msra.mxu1 %v3512_v29 }
 0x43b   :  { %1529 = vmatprep.subr.mxu0 %v3405_v0  ;;  %2556 = vmatprep.subr.mxu1 %v3771_v27 }
 0x43c   :  { %1530 = vmatpush1.msra.mxu0 %v3408_v1  ;;  %2557 = vmatpush3.msra.mxu1 %v3516_v30 }
 0x43d   :  { %1531 = vmatprep.subr.mxu0 %v3787_v11  ;;  %2558 = vmatprep.subr.mxu1 %v3771_v27 }
 0x43e   :  { %1532 = vmatpush1.msra.mxu0 %v3788_v48  ;;  %1565 = vmatprep.mubr.f32.mxu0 %v3771_v27  ;;  %v3793_v48 = vld [vmem:[#allocation29_spill] sm:$0xff] }
 0x43f   :  { %2559 = vmatpush3.msra.mxu1 %v3789_v12  ;;  %2560 = vmatprep.mubr.msk.f32.mxu1 %vm2773_vm5, %v3771_v27 }
 0x440   :  { %1726 = vmatprep.subr.mxu0 %v3790_v13  ;;  %2563 = vmatprep.subr.mxu1 %v3771_v27 }
 0x4df   :  { %v1342_v52 = vpop.f32.mrf.mxu0  ;;  %v1413_v32 = vpop.f32.mrf.mxu1 }
 0x4e0   :  { %v1417_v47 = vadd.f32 %v1342_v52, %v3791_v35 }
 0x4e1   :  { %v2527_v49 = vpop.f32.mrf.mxu1  ;;  %v1344_v34 = vpop.f32.mrf.mxu0 }
 0x4e2   :  { %v2171_v51 = vmul.f32 -1.442695, %v1417_v47  ;;  %v1424_v38 = vadd.f32 %v1344_v34, %v3792_v36  ;;  %v1444_v34 = vpop.permute.xlu0 %1443 }
 0x4e3   :  { %vm1445_vm14 = vcmp.eq.s32.totalorder %v1444_v34, 1  ;;  %v1904_v34 = vld [vmem:[#allocation4 + $0x8] sm:$0xff] }
 0x4e4   :  { %2684 = vpow2.f32 %v2171_v51  ;;  %v2172_v40 = vmul.f32 -1.442695, %v1424_v38 }
 0x4e6   :  { %2686 = vpow2.f32 %v2172_v40 }
 0x4f1   :  { %v2685_v41 = vpop.eup %2684 }
 0x4f2   :  { %v1421_v42 = vadd.f32 1.0, %v2685_v41  ;;  %v1919_v41 = vld [vmem:[#allocation4 + $0x80] sm:$0xff] }
 0x4f3   :  { %v2687_v43 = vpop.eup %2686 }
 0x4f4   :  { %2688 = vrcp.f32 %v1421_v42  ;;  %v1428_v45 = vadd.f32 1.0, %v2687_v43  ;;  %v1918_v42 = vld [vmem:[#allocation4 + $0x78] sm:$0xff]  ;;  %v1916_v43 = vld [vmem:[#allocation4 + $0x68] sm:$0xff] }
 0x4f6   :  { %2690 = vrcp.f32 %v1428_v45  ;;  %v1915_v45 = vld [vmem:[#allocation4 + $0x60] sm:$0xff] }
 0x501   :  { %v2689_v13 = vpop.eup %2688 }
 0x502   :  { %v1431_v12 = vmul.f32 %v2689_v13, %v1413_v32  ;;  %v1921_v32 = vld [vmem:[#allocation4 + $0x90] sm:$0xff] }
 0x503   :  { %v2691_v52 = vpop.eup %2690  ;;  %v1913_v13 = vld [vmem:[#allocation4 + $0x50] sm:$0xff] }
 0x504   :  { %v1432_v11 = vadd.f32 %v1431_v12, %v3793_v48  ;;  %v1434_v35 = vsub.f32 1.0, %v2691_v52  ;;  %v1436_v51 = vmul.f32 %v2691_v52, %v3531_v46  ;;  %v1924_v48 = vld [vmem:[#allocation4 + $0xa8] sm:$0xff]  ;;  %v1922_v12 = vld [vmem:[#allocation4 + $0x98] sm:$0xff] }
 0x505   :  { %v1912_v52 = vld [vmem:[#allocation4 + $0x48] sm:$0xff] }
 0x506   :  { %2692 = vtanh.f32 %v1432_v11  ;;  %v1925_v11 = vld [vmem:[#allocation4 + $0xb0] sm:$0xff] }
 0x513   :  { %v2693_v47 = vpop.eup %2692 }
 0x514   :  { %v1435_v49 = vmul.f32 %v2693_v47, %v1434_v35  ;;  %v1910_v35 = vld [vmem:[#allocation4 + $0x38] sm:$0xff]  ;;  %v1909_v47 = vld [vmem:[#allocation4 + $0x30] sm:$0xff] }
 0x516   :  { %v1437_v36 = vadd.f32 %v1436_v51, %v1435_v49  ;;  %v1907_v49 = vld [vmem:[#allocation4 + $0x20] sm:$0xff]  ;;  %v1906_v51 = vld [vmem:[#allocation4 + $0x18] sm:$0xff] }
 0x518   :  { %v1446_v38 = vsel %vm1445_vm14, %v1437_v36, 0.0  ;;  %v3607_v40 = vsel %vm1445_vm14, %v1437_v36, %v3531_v46  ;;  %v1903_v36 = vld [vmem:[#allocation4] sm:$0xff] }
 0x519   :  { %1448 = vst [vmem:[#allocation7 + $0x20] sm:$0xff] %v1446_v38  ;;  %1566 = vmatmul.mubr.f32.vlgmr.msra.gmra.mxu0 %v3607_v40  ;;  %2561 = vmatmul.mubr.f32.vlgmr.msra.gmra.mxu1 %v3607_v40 }
 0x51a   :  { %1727 = vmatpush1.msra.mxu0 %v3324_v55  ;;  %2564 = vmatpush3.msra.mxu1 %v3462_v53  ;;  %v3794_v55 = vld [vmem:[#allocation11_spill] sm:$0xff] }
 0x51b   :  { %1728 = vmatprep.subr.mxu0 %v3327_v57  ;;  %2565 = vmatprep.subr.mxu1 %v3771_v27  ;;  %v3795_v57 = vld [vmem:[#allocation12_spill] sm:$0xff] }
 0x51c   :  { %1729 = vmatpush1.msra.mxu0 %v3330_v58  ;;  %2566 = vmatpush3.msra.mxu1 %v3466_v54  ;;  %v3796_v58 = vld [vmem:[#allocation24_spill] sm:$0xff] }
 0x51d   :  { %1730 = vmatprep.subr.mxu0 %v3333_v60  ;;  %2567 = vmatprep.subr.mxu1 %v3771_v27 }
 0x51e   :  { %1731 = vmatpush1.msra.mxu0 %v3336_v61  ;;  %2568 = vmatpush3.msra.mxu1 %v3470_v56 }
 0x51f   :  { %1732 = vmatprep.subr.mxu0 %v3339_v63  ;;  %2569 = vmatprep.subr.mxu1 %v3771_v27  ;;  %v3797_v63 = vld [vmem:[#allocation19_spill] sm:$0xff] }
 0x520   :  { %1733 = vmatpush1.msra.mxu0 %v3342_v2  ;;  %2570 = vmatpush3.msra.mxu1 %v3474_v14 }
 0x521   :  { %1734 = vmatprep.subr.mxu0 %v3345_v4  ;;  %2571 = vmatprep.subr.mxu1 %v3771_v27 }
 0x522   :  { %1735 = vmatpush1.msra.mxu0 %v3348_v5  ;;  %2572 = vmatpush3.msra.mxu1 %v3478_v16 }
 0x523   :  { %1736 = vmatprep.subr.mxu0 %v3351_v7  ;;  %2573 = vmatprep.subr.mxu1 %v3771_v27 }
 0x524   :  { %1737 = vmatpush1.msra.mxu0 %v3354_v8  ;;  %2574 = vmatpush3.msra.mxu1 %v3482_v17  ;;  %v3798_v8 = vld [vmem:[#allocation20_spill] sm:$0xff] }
 0x525   :  { %1738 = vmatprep.subr.mxu0 %v3357_v9  ;;  %2575 = vmatprep.subr.mxu1 %v3771_v27 }
 0x526   :  { %1739 = vmatpush1.msra.mxu0 %v3360_v10  ;;  %2576 = vmatpush3.msra.mxu1 %v3486_v18 }
 0x527   :  { %1740 = vmatprep.subr.mxu0 %v3363_v15  ;;  %2577 = vmatprep.subr.mxu1 %v3771_v27 }
 0x528   :  { %1741 = vmatpush1.msra.mxu0 %v3365_v20  ;;  %2578 = vmatpush3.msra.mxu1 %v3489_v19 }
 0x529   :  { %1742 = vmatprep.subr.mxu0 %v3367_v25  ;;  %2579 = vmatprep.subr.mxu1 %v3771_v27 }
 0x52a   :  { %1743 = vmatpush1.msra.mxu0 %v3370_v31  ;;  %2580 = vmatpush3.msra.mxu1 %v3492_v22 }
 0x52b   :  { %1744 = vmatprep.subr.mxu0 %v3375_v33  ;;  %2581 = vmatprep.subr.mxu1 %v3771_v27 }
 0x52c   :  { %1745 = vmatpush1.msra.mxu0 %v3378_v62  ;;  %2582 = vmatpush3.msra.mxu1 %v3496_v23 }
 0x52d   :  { %1746 = vmatprep.subr.mxu0 %v3381_v37  ;;  %2583 = vmatprep.subr.mxu1 %v3771_v27  ;;  %v3799_v37 = vld [vmem:[#allocation28_spill] sm:$0xff] }
 0x52e   :  { %1747 = vmatpush1.msra.mxu0 %v3384_v39  ;;  %2584 = vmatpush3.msra.mxu1 %v3500_v24 }
 0x52f   :  { %1748 = vmatprep.subr.mxu0 %v3387_v44  ;;  %2585 = vmatprep.subr.mxu1 %v3771_v27 }
 0x530   :  { %1749 = vmatpush1.msra.mxu0 %v3390_v21  ;;  %2586 = vmatpush3.msra.mxu1 %v3504_v26 }
 0x531   :  { %1750 = vmatprep.subr.mxu0 %v3393_v50  ;;  %2587 = vmatprep.subr.mxu1 %v3771_v27 }
 0x532   :  { %1751 = vmatpush1.msra.mxu0 %v3396_v59  ;;  %2588 = vmatpush3.msra.mxu1 %v3508_v28 }
 0x533   :  { %1752 = vmatprep.subr.mxu0 %v3399_v3  ;;  %2589 = vmatprep.subr.mxu1 %v3771_v27 }
 0x534   :  { %1753 = vmatpush1.msra.mxu0 %v3402_v6  ;;  %2590 = vmatpush3.msra.mxu1 %v3512_v29  ;;  %v1669_v6 = vpop.permute.xlu1 %1668 }
 0x535   :  { %1754 = vmatprep.subr.mxu0 %v3405_v0  ;;  %2591 = vmatprep.subr.mxu1 %v3771_v27  ;;  %vm1670_vm15 = vcmp.eq.s32.totalorder %v1669_v6, 1 }
 0x536   :  { %1755 = vmatpush1.msra.mxu0 %v3408_v1  ;;  %2592 = vmatpush3.msra.mxu1 %v3516_v30 }
 0x537   :  { %1756 = vmatprep.subr.mxu0 %v3794_v55  ;;  %2593 = vmatprep.subr.mxu1 %v3771_v27  ;;  %v3800_v55 = vld [vmem:[#allocation21_spill] sm:$0xff] }
 0x538   :  { %1757 = vmatpush1.msra.mxu0 %v3795_v57  ;;  %1790 = vmatprep.mubr.f32.mxu0 %v3771_v27 }
 0x539   :  { %2594 = vmatpush3.msra.mxu1 %v3796_v58  ;;  %2595 = vmatprep.mubr.msk.f32.mxu1 %vm2773_vm5, %v3771_v27 }
 0x53a   :  { %2598 = vmatprep.subr.mxu1 %v3771_v27 }
 0x5d9   :  { %v1567_v60 = vpop.f32.mrf.mxu0  ;;  %v1638_v61 = vpop.f32.mrf.mxu1 }
 0x5da   :  { %v1642_v2 = vadd.f32 %v1567_v60, %v3797_v63  ;;  %v3801_v63 = vld [vmem:[#allocation22_spill] sm:$0xff] }
 0x5db   :  { %v2562_v4 = vpop.f32.mrf.mxu1  ;;  %v1569_v7 = vpop.f32.mrf.mxu0 }
 0x5dc   :  { %v2174_v5 = vmul.f32 -1.442695, %v1642_v2  ;;  %v1649_v9 = vadd.f32 %v1569_v7, %v3798_v8 }
 0x5de   :  { %2694 = vpow2.f32 %v2174_v5  ;;  %v2175_v10 = vmul.f32 -1.442695, %v1649_v9 }
 0x5e0   :  { %2696 = vpow2.f32 %v2175_v10 }
 0x5eb   :  { %v2695_v15 = vpop.eup %2694 }
 0x5ec   :  { %v1646_v20 = vadd.f32 1.0, %v2695_v15 }
 0x5ed   :  { %v2697_v25 = vpop.eup %2696 }
 0x5ee   :  { %2698 = vrcp.f32 %v1646_v20  ;;  %v1653_v31 = vadd.f32 1.0, %v2697_v25  ;;  %v3802_v20 = vld [vmem:[#allocation31_spill] sm:$0xff] }
 0x5f0   :  { %2700 = vrcp.f32 %v1653_v31 }
 0x5fb   :  { %v2699_v33 = vpop.eup %2698 }
 0x5fc   :  { %v1656_v62 = vmul.f32 %v2699_v33, %v1638_v61 }
 0x5fd   :  { %v2701_v44 = vpop.eup %2700 }
 0x5fe   :  { %v1657_v39 = vadd.f32 %v3799_v37, %v1656_v62  ;;  %v1659_v21 = vsub.f32 1.0, %v2701_v44  ;;  %v1661_v3 = vmul.f32 %v2701_v44, %v3607_v40  ;;  %v1894_v37 = vpop.permute.xlu0 %1893 }
 0x5ff   :  { %vm1895_vm0 = vcmp.eq.s32.totalorder %v1894_v37, 1 }
 0x600   :  { %2702 = vtanh.f32 %v1657_v39 }
 0x60d   :  { %v2703_v50 = vpop.eup %2702 }
 0x60e   :  { %v1660_v59 = vmul.f32 %v2703_v50, %v1659_v21 }
 0x610   :  { %v1662_v0 = vadd.f32 %v1661_v3, %v1660_v59 }
 0x612   :  { %v1671_v1 = vsel %vm1670_vm15, %v1662_v0, 0.0  ;;  %v3682_v46 = vsel %vm1670_vm15, %v1662_v0, %v3607_v40  ;;  %v3803_v0 = vld [vmem:[#allocation23_spill] sm:$0xff] }
 0x613   :  { %1673 = vst [vmem:[#allocation7 + $0x28] sm:$0xff] %v1671_v1  ;;  %1791 = vmatmul.mubr.f32.vlgmr.msra.gmra.mxu0 %v3682_v46  ;;  %2596 = vmatmul.mubr.f32.vlgmr.msra.gmra.mxu1 %v3682_v46 }
 0x614   :  { %2599 = vmatpush3.msra.mxu1 %v3462_v53  ;;  %2015 = vmatprep.mubr.f32.mxu0 %v3771_v27  ;;  %v1949_v53 = vld [vmem:[#allocation4 + $0x170] sm:$0xff] }
 0x615   :  { %2600 = vmatprep.subr.mxu1 %v3771_v27  ;;  %2630 = vmatprep.mubr.msk.f32.mxu1 %vm2773_vm5, %v3771_v27 }
 0x616   :  { %2601 = vmatpush3.msra.mxu1 %v3466_v54  ;;  %1951 = vmatprep.subr.mxu0 %v1949_v53  ;;  %v1948_v54 = vld [vmem:[#allocation4 + $0x168] sm:$0xff] }
 0x617   :  { %2602 = vmatprep.subr.mxu1 %v3771_v27  ;;  %1952 = vmatpush1.msra.mxu0 %v1948_v54 }
 0x618   :  { %2603 = vmatpush3.msra.mxu1 %v3470_v56  ;;  %v1946_v56 = vld [vmem:[#allocation4 + $0x158] sm:$0xff] }
 0x619   :  { %2604 = vmatprep.subr.mxu1 %v3771_v27  ;;  %1953 = vmatprep.subr.mxu0 %v1946_v56 }
 0x61a   :  { %2605 = vmatpush3.msra.mxu1 %v3474_v14  ;;  %v1945_v14 = vld [vmem:[#allocation4 + $0x150] sm:$0xff] }
 0x61b   :  { %2606 = vmatprep.subr.mxu1 %v3771_v27  ;;  %1954 = vmatpush1.msra.mxu0 %v1945_v14  ;;  %v3804_v14 = vld [vmem:[#allocation25_spill] sm:$0xff] }
 0x61c   :  { %2607 = vmatpush3.msra.mxu1 %v3478_v16  ;;  %v1943_v16 = vld [vmem:[#allocation4 + $0x140] sm:$0xff] }
 0x61d   :  { %2608 = vmatprep.subr.mxu1 %v3771_v27  ;;  %1955 = vmatprep.subr.mxu0 %v1943_v16 }
 0x61e   :  { %2609 = vmatpush3.msra.mxu1 %v3482_v17  ;;  %v1942_v17 = vld [vmem:[#allocation4 + $0x138] sm:$0xff] }
 0x61f   :  { %2610 = vmatprep.subr.mxu1 %v3771_v27  ;;  %1956 = vmatpush1.msra.mxu0 %v1942_v17 }
 0x620   :  { %2611 = vmatpush3.msra.mxu1 %v3486_v18  ;;  %v1940_v18 = vld [vmem:[#allocation4 + $0x128] sm:$0xff] }
 0x621   :  { %2612 = vmatprep.subr.mxu1 %v3771_v27  ;;  %1957 = vmatprep.subr.mxu0 %v1940_v18 }
 0x622   :  { %2613 = vmatpush3.msra.mxu1 %v3489_v19  ;;  %v1939_v19 = vld [vmem:[#allocation4 + $0x120] sm:$0xff] }
 0x623   :  { %2614 = vmatprep.subr.mxu1 %v3771_v27  ;;  %1958 = vmatpush1.msra.mxu0 %v1939_v19 }
 0x624   :  { %2615 = vmatpush3.msra.mxu1 %v3492_v22  ;;  %v1937_v22 = vld [vmem:[#allocation4 + $0x110] sm:$0xff] }
 0x625   :  { %2616 = vmatprep.subr.mxu1 %v3771_v27  ;;  %1959 = vmatprep.subr.mxu0 %v1937_v22 }
 0x626   :  { %2617 = vmatpush3.msra.mxu1 %v3496_v23  ;;  %v1934_v23 = vld [vmem:[#allocation4 + $0xf8] sm:$0xff] }
 0x627   :  { %2618 = vmatprep.subr.mxu1 %v3771_v27 }
 0x628   :  { %2619 = vmatpush3.msra.mxu1 %v3500_v24  ;;  %v1933_v24 = vld [vmem:[#allocation4 + $0xf0] sm:$0xff] }
 0x629   :  { %2620 = vmatprep.subr.mxu1 %v3771_v27 }
 0x62a   :  { %2621 = vmatpush3.msra.mxu1 %v3504_v26  ;;  %v1931_v26 = vld [vmem:[#allocation4 + $0xe0] sm:$0xff] }
 0x62b   :  { %2622 = vmatprep.subr.mxu1 %v3771_v27 }
 0x62c   :  { %2623 = vmatpush3.msra.mxu1 %v3508_v28  ;;  %v1930_v28 = vld [vmem:[#allocation4 + $0xd8] sm:$0xff] }
 0x62d   :  { %2624 = vmatprep.subr.mxu1 %v3771_v27 }
 0x62e   :  { %2625 = vmatpush3.msra.mxu1 %v3512_v29  ;;  %v1928_v29 = vld [vmem:[#allocation4 + $0xc8] sm:$0xff] }
 0x62f   :  { %2626 = vmatprep.subr.mxu1 %v3771_v27 }
 0x630   :  { %2627 = vmatpush3.msra.mxu1 %v3516_v30  ;;  %v1927_v30 = vld [vmem:[#allocation4 + $0xc0] sm:$0xff] }
 0x631   :  { %2628 = vmatprep.subr.mxu1 %v3771_v27  ;;  %v1936_v27 = vld [vmem:[#allocation4 + $0x108] sm:$0xff] }
 0x632   :  { %2629 = vmatpush3.msra.mxu1 %v3796_v58  ;;  %1960 = vmatpush1.msra.mxu0 %v1936_v27 }
 0x633   :  { %1961 = vmatprep.subr.mxu0 %v1934_v23 }
 0x634   :  { %1962 = vmatpush1.msra.mxu0 %v1933_v24  ;;  %v3805_v24 = vld [vmem:[#allocation30_spill] sm:$0xff] }
 0x635   :  { %1963 = vmatprep.subr.mxu0 %v1931_v26 }
 0x636   :  { %1964 = vmatpush1.msra.mxu0 %v1930_v28 }
 0x637   :  { %1965 = vmatprep.subr.mxu0 %v1928_v29 }
 0x638   :  { %1966 = vmatpush1.msra.mxu0 %v1927_v30 }
 0x639   :  { %1967 = vmatprep.subr.mxu0 %v1925_v11  ;;  %v2119_v11 = vpop.permute.xlu1 %2118 }
 0x63a   :  { %1968 = vmatpush1.msra.mxu0 %v1924_v48  ;;  %vm2120_vm1 = vcmp.eq.s32.totalorder %v2119_v11, 1 }
 0x63b   :  { %1969 = vmatprep.subr.mxu0 %v1922_v12 }
 0x63c   :  { %1970 = vmatpush1.msra.mxu0 %v1921_v32 }
 0x63d   :  { %1971 = vmatprep.subr.mxu0 %v1919_v41 }
 0x63e   :  { %1972 = vmatpush1.msra.mxu0 %v1918_v42 }
 0x63f   :  { %1973 = vmatprep.subr.mxu0 %v1916_v43 }
 0x640   :  { %1974 = vmatpush1.msra.mxu0 %v1915_v45 }
 0x641   :  { %1975 = vmatprep.subr.mxu0 %v1913_v13 }
 0x642   :  { %1976 = vmatpush1.msra.mxu0 %v1912_v52 }
 0x643   :  { %1977 = vmatprep.subr.mxu0 %v1910_v35 }
 0x644   :  { %1978 = vmatpush1.msra.mxu0 %v1909_v47 }
 0x645   :  { %1979 = vmatprep.subr.mxu0 %v1907_v49 }
 0x646   :  { %1980 = vmatpush1.msra.mxu0 %v1906_v51 }
 0x647   :  { %1981 = vmatprep.subr.mxu0 %v1904_v34 }
 0x648   :  { %1982 = vmatpush1.msra.mxu0 %v1903_v36 }
 0x6d3   :  { %v1792_v38 = vpop.f32.mrf.mxu0  ;;  %v1863_v40 = vpop.f32.mrf.mxu1 }
 0x6d4   :  { %v1867_v57 = vadd.f32 %v1792_v38, %v3800_v55 }
 0x6d5   :  { %v2597_v58 = vpop.f32.mrf.mxu1  ;;  %v1794_v61 = vpop.f32.mrf.mxu0 }
 0x6d6   :  { %v2177_v60 = vmul.f32 -1.442695, %v1867_v57  ;;  %v1874_v2 = vadd.f32 %v1794_v61, %v3801_v63 }
 0x6d8   :  { %2704 = vpow2.f32 %v2177_v60  ;;  %v2178_v4 = vmul.f32 -1.442695, %v1874_v2 }
 0x6da   :  { %2706 = vpow2.f32 %v2178_v4 }
 0x6e5   :  { %v2705_v5 = vpop.eup %2704 }
 0x6e6   :  { %v1871_v7 = vadd.f32 1.0, %v2705_v5 }
 0x6e7   :  { %v2707_v8 = vpop.eup %2706 }
 0x6e8   :  { %2708 = vrcp.f32 %v1871_v7  ;;  %v1878_v9 = vadd.f32 1.0, %v2707_v8 }
 0x6ea   :  { %2710 = vrcp.f32 %v1878_v9 }
 0x6f5   :  { %v2709_v10 = vpop.eup %2708 }
 0x6f6   :  { %v1881_v15 = vmul.f32 %v2709_v10, %v1863_v40 }
 0x6f7   :  { %v2711_v31 = vpop.eup %2710 }
 0x6f8   :  { %v1882_v25 = vadd.f32 %v1881_v15, %v3802_v20  ;;  %v1884_v33 = vsub.f32 1.0, %v2711_v31  ;;  %v1886_v44 = vmul.f32 %v2711_v31, %v3682_v46 }
 0x6fa   :  { %2712 = vtanh.f32 %v1882_v25 }
 0x707   :  { %v2713_v62 = vpop.eup %2712 }
 0x708   :  { %v1885_v39 = vmul.f32 %v2713_v62, %v1884_v33 }
 0x70a   :  { %v1887_v21 = vadd.f32 %v1886_v44, %v1885_v39 }
 0x70c   :  { %v1896_v50 = vsel %vm1895_vm0, %v1887_v21, 0.0  ;;  %v1899_v59 = vsel %vm1895_vm0, %v1887_v21, %v3682_v46 }
 0x70d   :  { %1898 = vst [vmem:[#allocation7 + $0x30] sm:$0xff] %v1896_v50  ;;  %2016 = vmatmul.mubr.f32.vlgmr.msra.gmra.mxu0 %v1899_v59  ;;  %2631 = vmatmul.mubr.f32.vlgmr.msra.gmra.mxu1 %v1899_v59 }
 0x7cd   :  { %v2017_v3 = vpop.f32.mrf.mxu0  ;;  %v2088_v6 = vpop.f32.mrf.mxu1 }
 0x7ce   :  { %v2092_v1 = vadd.f32 %v2017_v3, %v3803_v0 }
 0x7cf   :  { %v2632_v53 = vpop.f32.mrf.mxu1  ;;  %v2019_v56 = vpop.f32.mrf.mxu0 }
 0x7d0   :  { %v2180_v54 = vmul.f32 -1.442695, %v2092_v1  ;;  %v2099_v16 = vadd.f32 %v2019_v56, %v3804_v14 }
 0x7d2   :  { %2714 = vpow2.f32 %v2180_v54  ;;  %v2181_v17 = vmul.f32 -1.442695, %v2099_v16 }
 0x7d4   :  { %2716 = vpow2.f32 %v2181_v17 }
 0x7df   :  { %v2715_v18 = vpop.eup %2714 }
 0x7e0   :  { %v2096_v19 = vadd.f32 1.0, %v2715_v18 }
 0x7e1   :  { %v2717_v22 = vpop.eup %2716 }
 0x7e2   :  { %2718 = vrcp.f32 %v2096_v19  ;;  %v2103_v46 = vadd.f32 1.0, %v2717_v22 }
 0x7e4   :  { %2720 = vrcp.f32 %v2103_v46 }
 0x7ef   :  { %v2719_v27 = vpop.eup %2718 }
 0x7f0   :  { %v2106_v23 = vmul.f32 %v2719_v27, %v2088_v6 }
 0x7f1   :  { %v2721_v28 = vpop.eup %2720 }
 0x7f2   :  { %v2107_v26 = vadd.f32 %v3805_v24, %v2106_v23  ;;  %v2109_v29 = vsub.f32 1.0, %v2721_v28  ;;  %v2111_v12 = vmul.f32 %v2721_v28, %v1899_v59 }
 0x7f4   :  { %2722 = vtanh.f32 %v2107_v26 }
 0x801   :  { %v2723_v30 = vpop.eup %2722 }
 0x802   :  { %v2110_v48 = vmul.f32 %v2723_v30, %v2109_v29 }
 0x804   :  { %v2112_v32 = vadd.f32 %v2111_v12, %v2110_v48 }
 0x806   :  { %v2121_v41 = vsel %vm2120_vm1, %v2112_v32, 0.0 }
 0x807   :  { %2123 = vst [vmem:[#allocation7 + $0x38] sm:$0xff] %v2121_v41 }
 0x808   :  { %2755 = shalt.err (!%p2752_p9)
}
 0x809   :  { %s2775_s10 = smov 128   ;;  %s2776_s11 = smov 8  }
 0x80a   :  { %2137 = dma.vmem_to_hbm [thread:$0]  %s2132_s1, 1024, %s3735_s4, [#allocation6], %s2775_s10, %s2775_s10, %s2776_s11  }
 0x80b   :  { %2766 = dma.done.wait [#allocation6], 1024  }
 0x80c   :  { %2767 = vsyncadd [#allocation6], 4294966272 }
 0x80d   :  { %2141 = vsyncpa [#allocation5], 1 }
 0x80e   :  { %2142 = vsyncpa [#allocation6], 1 }

</bundles_post_ra>
